<compile_context>
chip_gen: v7x
topology: tpu7x:2x2x1
jax: 0.10.0
libtpu: 0.0.40
codegen_flags: <defaults>
</compile_context>

<pallas_src>
import functools

import jax
import jax.numpy as jnp
from jax import lax
from jax.experimental import pallas as pl
from jax.experimental.pallas import tpu as pltpu


def _msa_kernel(x_ref, wqkv_ref, wproj_ref, bproj_ref, o_ref, *, num_heads, scale):
    # x_ref:     (Bt, N, D)  f32   Bt batch elements per grid step
    # wqkv_ref:  (3D, D)     bf16  qkv weight, torch (out, in) layout (qkv_bias=False)
    # wproj_ref: (D, D)      bf16  proj weight, torch (out, in) layout
    # bproj_ref: (1, D)      f32   proj bias
    # o_ref:     (Bt, N, D)  f32
    Bt, N, D = x_ref.shape
    H = num_heads
    hd = D // H
    M = Bt * N

    # Cast x to bf16 *inside* the kernel (x was DMA'd as f32; no wrapper cast pass).
    x = x_ref[...].reshape(M, D).astype(jnp.bfloat16)            # (M, D) bf16

    # ---- Fused QKV projection: y = x @ Wqkv.T -> (M, 3D), one MXU weight stream,
    # f32 accumulation, lane-dense output.
    qkv = lax.dot_general(
        x, wqkv_ref[...],
        dimension_numbers=(((1,), (1,)), ((), ())),
        preferred_element_type=jnp.float32)                      # (M, 3D) f32

    q = qkv[:, 0 * D:1 * D] * scale      # fold 1/sqrt(hd) into q ((M,D)-sized mul)
    k = qkv[:, 1 * D:2 * D]
    v = qkv[:, 2 * D:3 * D]

    # ---- Fold heads + batch into one leading "group" dim g = (h, b) so the
    # attention matmuls are single-batch-dim dot_generals (flash layout).
    # Only minor-dim-preserving 3-D transposes / reshapes are used.
    # TODO(synk): at tiny head_dim (hd=8 here) the (M,D)->(M,H,hd) lane split
    # costs an XLU relayout; production head_dim >= 64 avoids most of it.
    def to_heads(t):                       # (M, D) -> (H*Bt, N, hd) bf16
        t = t.reshape(M, H, hd)            # split embed dim into heads
        t = jnp.transpose(t, (1, 0, 2))    # (H, M, hd), minor dim untouched
        return t.reshape(H * Bt, N, hd).astype(jnp.bfloat16)

    qh = to_heads(q)
    kh = to_heads(k)
    vh = to_heads(v)

    # ---- Scores + softmax (f32 arithmetic, bf16 MXU operands, f32 accumulation).
    s = jnp.einsum('gqd,gkd->gqk', qh, kh,
                   preferred_element_type=jnp.float32)           # (G, N, N) f32
    s = s - jnp.max(s, axis=-1, keepdims=True)                   # stabilized softmax
    e = jnp.exp(s)
    denom = jnp.sum(e, axis=-1, keepdims=True)                   # (G, N, 1)

    # attn_drop is Dropout(0.0) -> identity.
    # Unnormalized PV matmul; normalization deferred to the small (G, N, hd)
    # output (~N/hd x fewer VPU multiplies than normalizing (G, N, N) probs).
    o = jnp.einsum('gqk,gkd->gqd', e.astype(jnp.bfloat16), vh,
                   preferred_element_type=jnp.float32)           # (G, N, hd) f32
    o = o * pl.reciprocal(denom, approx=True)                    # EUP reciprocal

    # Concat heads back: (H*Bt, N, hd) -> (M, D).
    o = jnp.transpose(o.reshape(H, M, hd), (1, 0, 2)).reshape(M, D)

    # ---- Output projection + bias (proj_drop is Dropout(0.0) -> identity).
    y = lax.dot_general(
        o.astype(jnp.bfloat16), wproj_ref[...],
        dimension_numbers=(((1,), (1,)), ((), ())),
        preferred_element_type=jnp.float32) + bproj_ref[...]
    o_ref[...] = y.reshape(Bt, N, D).astype(o_ref.dtype)


def _choose_block_batch(B, N, target_m=256):
    """How many batch elements each grid step processes.

    Prefer the smallest divisor Bt of B with Bt*N >= target_m (fills the MXU M
    dimension / enlarges DMAs while keeping the most grid steps for pipelining
    and megacore splitting).  If the target is unreachable, keep at least two
    grid steps when possible so v7x's two TensorCores both get work.
    """
    divisors = [d for d in range(1, B + 1) if B % d == 0]
    for d in divisors:
        if d * N >= target_m:
            return d
    multi_step = [d for d in divisors if B // d >= 2]
    return max(multi_step) if multi_step else B


def msa_pallas(x, w_qkv, w_proj, b_proj, num_heads, qk_scale=None):
    """x: (B, N, D) f32.  w_qkv: (3D, D), w_proj: (D, D), b_proj: (D,) -- torch
    (out_features, in_features) layout."""
    B, N, D = x.shape
    hd = D // num_heads
    scale = float(qk_scale) if qk_scale is not None else hd ** (-0.5)

    Bt = _choose_block_batch(B, N)
    grid = (B // Bt,)

    # Weights/bias cast once here (in a real model they would be stored bf16 at
    # load time).  x itself is NOT pre-cast: it is DMA'd as f32 and cast inside
    # the kernel, avoiding an extra HBM read+write pass over the activations.
    w_qkv_bf = w_qkv.astype(jnp.bfloat16)
    w_proj_bf = w_proj.astype(jnp.bfloat16)
    b_proj2 = b_proj.reshape(1, D).astype(jnp.float32)

    kernel = functools.partial(_msa_kernel, num_heads=num_heads, scale=scale)
    return pl.pallas_call(
        kernel,
        # Output stays f32 to match the module; emit bf16 here if downstream
        # accepts it (halves writeback bytes in the memory-bound regime).
        out_shape=jax.ShapeDtypeStruct((B, N, D), x.dtype),
        grid_spec=pltpu.PrefetchScalarGridSpec(
            num_scalar_prefetch=0,
            grid=grid,
            in_specs=[
                pl.BlockSpec((Bt, N, D), lambda i: (i, 0, 0)),
                # Weights/bias map to the same block at every grid step, so the
                # pipeline does not re-issue their DMAs between steps.
                pl.BlockSpec((3 * D, D), lambda i: (0, 0)),
                pl.BlockSpec((D, D), lambda i: (0, 0)),
                pl.BlockSpec((1, D), lambda i: (0, 0)),
            ],
            out_specs=pl.BlockSpec((Bt, N, D), lambda i: (i, 0, 0)),
        ),
        compiler_params=pltpu.CompilerParams(
            # Grid steps (batch blocks) are independent -> megacore / multi-TC split.
            dimension_semantics=("parallel",),
            # Allow larger-than-default scoped VMEM for big (Bt, N, D) blocks
            # (default scoped limit: 16 MiB v5e / 32 MiB v6e, v7x).
            vmem_limit_bytes=64 * 1024 * 1024,
        ),
    )(x, w_qkv_bf, w_proj_bf, b_proj2)


def msa_reference(x, w_qkv, w_proj, b_proj, num_heads):
    """Pure-JAX f32 replica of the PyTorch forward (dropout p=0)."""
    B, N, D = x.shape
    hd = D // num_heads
    scale = hd ** (-0.5)
    qkv = x @ w_qkv.T                                            # (B, N, 3D)
    qkv = qkv.reshape(B, N, 3, num_heads, hd).transpose(2, 0, 3, 1, 4)
    q, k, v = qkv[0], qkv[1], qkv[2]                             # (B, H, N, hd)
    attn = jax.nn.softmax((q @ jnp.swapaxes(k, -2, -1)) * scale, axis=-1)
    out = (attn @ v).transpose(0, 2, 1, 3).reshape(B, N, D)
    return out @ w_proj.T + b_proj


if __name__ == "__main__":
    # Small shapes consistent with the module: B=4 batches, N=8 tokens,
    # D=64 embed dim, 8 heads (head_dim=8).  Block-batch chooser -> Bt=2,
    # grid=(2,) so the pipeline / megacore split is exercised.
    B, N, D, H = 4, 8, 64, 8

    key = jax.random.PRNGKey(0)
    kx, kq, kp, kb = jax.random.split(key, 4)
    x = jax.random.normal(kx, (B, N, D), dtype=jnp.float32)
    # nn.Linear(dim, 3*dim, bias=False) and nn.Linear(dim, dim): torch layout
    # (out_features, in_features).
    w_qkv = jax.random.normal(kq, (3 * D, D), dtype=jnp.float32) * (D ** -0.5)
    w_proj = jax.random.normal(kp, (D, D), dtype=jnp.float32) * (D ** -0.5)
    b_proj = jax.random.normal(kb, (D,), dtype=jnp.float32) * 0.01

    out = msa_pallas(x, w_qkv, w_proj, b_proj, H)
    out = jax.block_until_ready(out)

    ref = msa_reference(x, w_qkv, w_proj, b_proj, H)
    assert out.shape == (B, N, D)
    # bf16 MXU operands throughout (f32 accumulation, f32 softmax) + approx
    # reciprocal -> bf16-level tolerance against the pure-f32 reference.
    max_err = jnp.max(jnp.abs(out - ref))
    assert jnp.allclose(out, ref, atol=5e-2, rtol=5e-2), f"max abs err {max_err}"

    print("KERNEL_OK")
</pallas_src>

<mosaic_0001>
module attributes {stable_mosaic.version = 11 : i64} {
  func.func @_msa_kernel(%arg0: i32, %arg1: memref<2x8x64xf32, #tpu.memory_space<vmem>>, %arg2: memref<192x64xbf16, #tpu.memory_space<vmem>>, %arg3: memref<64x64xbf16, #tpu.memory_space<vmem>>, %arg4: memref<1x64xf32, #tpu.memory_space<vmem>>, %arg5: memref<2x8x64xf32, #tpu.memory_space<vmem>>) attributes {dimension_semantics = [#tpu.dimension_semantics<parallel>], iteration_bounds = array<i64: 2>, scalar_prefetch = 0 : i64, scratch_operands = 0 : i64, tpu.core_type = #tpu.core_type<tc>, window_params = [{transform_indices = @transform_0, window_bounds = array<i64: 2, 8, 64>}, {pipeline_mode = #tpu.pipeline_mode<synchronous>, transform_indices = @transform_1, window_bounds = array<i64: 192, 64>}, {pipeline_mode = #tpu.pipeline_mode<synchronous>, transform_indices = @transform_2, window_bounds = array<i64: 64, 64>}, {pipeline_mode = #tpu.pipeline_mode<synchronous>, transform_indices = @transform_3, window_bounds = array<i64: 1, 64>}, {transform_indices = @transform_4, window_bounds = array<i64: 2, 8, 64>}]} {
    %c0 = arith.constant 0 : index
    %c0_0 = arith.constant 0 : index
    %c0_1 = arith.constant 0 : index
    %0 = vector.load %arg1[%c0, %c0_0, %c0_1] : memref<2x8x64xf32, #tpu.memory_space<vmem>>, vector<2x8x64xf32>
    %1 = vector.shape_cast %0 : vector<2x8x64xf32> to vector<16x64xf32>
    %2 = arith.truncf %1 : vector<16x64xf32> to vector<16x64xbf16>
    %c0_2 = arith.constant 0 : index
    %c0_3 = arith.constant 0 : index
    %3 = vector.load %arg2[%c0_2, %c0_3] : memref<192x64xbf16, #tpu.memory_space<vmem>>, vector<192x64xbf16>
    %cst = arith.constant dense<0.000000e+00> : vector<16x192xf32>
    %4 = tpu.matmul %2, %3, %cst {dimension_numbers = #tpu.dot_dimension_numbers<[1], [1], [0], [0], [0, 0, 1, 0], [], []>} : vector<16x64xbf16>, vector<192x64xbf16>, vector<16x192xf32> -> vector<16x192xf32>
    %5 = vector.extract_strided_slice %4 {offsets = [0, 0], sizes = [16, 64], strides = [1, 1]} : vector<16x192xf32> to vector<16x64xf32>
    %cst_4 = arith.constant 0.353553385 : f32
    %6 = vector.broadcast %cst_4 : f32 to vector<16x64xf32>
    %7 = arith.mulf %5, %6 : vector<16x64xf32>
    %8 = vector.extract_strided_slice %4 {offsets = [0, 64], sizes = [16, 64], strides = [1, 1]} : vector<16x192xf32> to vector<16x64xf32>
    %9 = vector.extract_strided_slice %4 {offsets = [0, 128], sizes = [16, 64], strides = [1, 1]} : vector<16x192xf32> to vector<16x64xf32>
    %10 = vector.shape_cast %7 : vector<16x64xf32> to vector<16x8x8xf32>
    %11 = tpu.transpose %10, [1, 0, 2] : vector<16x8x8xf32> -> vector<8x16x8xf32>
    %12 = vector.shape_cast %11 : vector<8x16x8xf32> to vector<16x8x8xf32>
    %13 = arith.truncf %12 : vector<16x8x8xf32> to vector<16x8x8xbf16>
    %14 = vector.shape_cast %8 : vector<16x64xf32> to vector<16x8x8xf32>
    %15 = tpu.transpose %14, [1, 0, 2] : vector<16x8x8xf32> -> vector<8x16x8xf32>
    %16 = vector.shape_cast %15 : vector<8x16x8xf32> to vector<16x8x8xf32>
    %17 = arith.truncf %16 : vector<16x8x8xf32> to vector<16x8x8xbf16>
    %18 = vector.shape_cast %9 : vector<16x64xf32> to vector<16x8x8xf32>
    %19 = tpu.transpose %18, [1, 0, 2] : vector<16x8x8xf32> -> vector<8x16x8xf32>
    %20 = vector.shape_cast %19 : vector<8x16x8xf32> to vector<16x8x8xf32>
    %21 = arith.truncf %20 : vector<16x8x8xf32> to vector<16x8x8xbf16>
    "tpu.trace_start"() <{level = 10 : i32, message = "gqd,gkd->gqk"}> : () -> ()
    %cst_5 = arith.constant dense<0.000000e+00> : vector<16x8x8xf32>
    %22 = tpu.matmul %13, %17, %cst_5 {dimension_numbers = #tpu.dot_dimension_numbers<[2], [2], [1], [1], [0, 0, 0, 1, 1, 1], [0], [0]>} : vector<16x8x8xbf16>, vector<16x8x8xbf16>, vector<16x8x8xf32> -> vector<16x8x8xf32>
    "tpu.trace_stop"() : () -> ()
    %cst_6 = arith.constant dense<0xFF800000> : vector<16x8xf32>
    %23 = vector.multi_reduction <maximumf>, %22, %cst_6 [2] : vector<16x8x8xf32> to vector<16x8xf32>
    %24 = vector.shape_cast %23 : vector<16x8xf32> to vector<16x8x1xf32>
    %25 = vector.broadcast %24 : vector<16x8x1xf32> to vector<16x8x8xf32>
    %26 = arith.subf %22, %25 : vector<16x8x8xf32>
    %27 = math.exp %26 : vector<16x8x8xf32>
    %cst_7 = arith.constant dense<0.000000e+00> : vector<16x8xf32>
    %28 = vector.multi_reduction <add>, %27, %cst_7 [2] : vector<16x8x8xf32> to vector<16x8xf32>
    %29 = vector.shape_cast %28 : vector<16x8xf32> to vector<16x8x1xf32>
    %30 = arith.truncf %27 : vector<16x8x8xf32> to vector<16x8x8xbf16>
    "tpu.trace_start"() <{level = 10 : i32, message = "gqk,gkd->gqd"}> : () -> ()
    %cst_8 = arith.constant dense<0.000000e+00> : vector<16x8x8xf32>
    %31 = tpu.matmul %30, %21, %cst_8 {dimension_numbers = #tpu.dot_dimension_numbers<[2], [1], [1], [2], [0, 0, 0, 1, 1, 2], [0], [0]>} : vector<16x8x8xbf16>, vector<16x8x8xbf16>, vector<16x8x8xf32> -> vector<16x8x8xf32>
    "tpu.trace_stop"() : () -> ()
    %32 = tpu.reciprocal %29 {approx = true} : vector<16x8x1xf32> -> vector<16x8x1xf32>
    %33 = vector.broadcast %32 : vector<16x8x1xf32> to vector<16x8x8xf32>
    %34 = arith.mulf %31, %33 : vector<16x8x8xf32>
    %35 = vector.shape_cast %34 : vector<16x8x8xf32> to vector<8x16x8xf32>
    %36 = tpu.transpose %35, [1, 0, 2] : vector<8x16x8xf32> -> vector<16x8x8xf32>
    %37 = vector.shape_cast %36 : vector<16x8x8xf32> to vector<16x64xf32>
    %38 = arith.truncf %37 : vector<16x64xf32> to vector<16x64xbf16>
    %c0_9 = arith.constant 0 : index
    %c0_10 = arith.constant 0 : index
    %39 = vector.load %arg3[%c0_9, %c0_10] : memref<64x64xbf16, #tpu.memory_space<vmem>>, vector<64x64xbf16>
    %cst_11 = arith.constant dense<0.000000e+00> : vector<16x64xf32>
    %40 = tpu.matmul %38, %39, %cst_11 {dimension_numbers = #tpu.dot_dimension_numbers<[1], [1], [0], [0], [0, 0, 1, 0], [], []>} : vector<16x64xbf16>, vector<64x64xbf16>, vector<16x64xf32> -> vector<16x64xf32>
    %c0_12 = arith.constant 0 : index
    %c0_13 = arith.constant 0 : index
    %41 = vector.load %arg4[%c0_12, %c0_13] : memref<1x64xf32, #tpu.memory_space<vmem>>, vector<1x64xf32>
    %42 = vector.broadcast %41 : vector<1x64xf32> to vector<16x64xf32>
    %43 = arith.addf %40, %42 : vector<16x64xf32>
    %44 = vector.shape_cast %43 : vector<16x64xf32> to vector<2x8x64xf32>
    %c0_14 = arith.constant 0 : index
    %c0_15 = arith.constant 0 : index
    %c0_16 = arith.constant 0 : index
    %45 = vector.load %arg5[%c0_14, %c0_15, %c0_16] : memref<2x8x64xf32, #tpu.memory_space<vmem>>, vector<2x8x64xf32>
    tpu.vector_store %arg5[%c0_14, %c0_15, %c0_16], %44 {strides = array<i32>} : memref<2x8x64xf32, #tpu.memory_space<vmem>>, vector<2x8x64xf32>,
    return
  }
  func.func @transform_0(%arg0: i32) -> (i32, i32, i32) {
    %c0_i32 = arith.constant 0 : i32
    %c0_i32_0 = arith.constant 0 : i32
    %c0_i32_1 = arith.constant 0 : i32
    return %arg0, %c0_i32, %c0_i32_0 : i32, i32, i32
  }
  func.func @transform_1(%arg0: i32) -> (i32, i32) {
    %c0_i32 = arith.constant 0 : i32
    %c0_i32_0 = arith.constant 0 : i32
    %c0_i32_1 = arith.constant 0 : i32
    return %c0_i32, %c0_i32_0 : i32, i32
  }
  func.func @transform_2(%arg0: i32) -> (i32, i32) {
    %c0_i32 = arith.constant 0 : i32
    %c0_i32_0 = arith.constant 0 : i32
    %c0_i32_1 = arith.constant 0 : i32
    return %c0_i32, %c0_i32_0 : i32, i32
  }
  func.func @transform_3(%arg0: i32) -> (i32, i32) {
    %c0_i32 = arith.constant 0 : i32
    %c0_i32_0 = arith.constant 0 : i32
    %c0_i32_1 = arith.constant 0 : i32
    return %c0_i32, %c0_i32_0 : i32, i32
  }
  func.func @transform_4(%arg0: i32) -> (i32, i32, i32) {
    %c0_i32 = arith.constant 0 : i32
    %c0_i32_0 = arith.constant 0 : i32
    %c0_i32_1 = arith.constant 0 : i32
    return %arg0, %c0_i32, %c0_i32_0 : i32, i32, i32
  }
}

</mosaic_0001>

<bundles_post_ra>
// kernel: tpu_custom_call.1
= control target key start
LH: loop header
LB: loop body
LE: loop exit
PB: predicated region body
PF: predicated region fallthrough
CT: control target
= control target key end

     0   :  { %9 = vsyncpa [#allocation3], 0  ;;  %s6844_s0 = inlined_call_operand.hbm [shape: f32[4,8,64], index: 0, kind: input, shape index: {}]   ;;  %s6845_s1 = inlined_call_operand.hbm [shape: bf16[192,64], index: 1, kind: input, shape index: {}]   ;;  %s6846_s2 = inlined_call_operand.hbm [shape: bf16[64,64], index: 2, kind: input, shape index: {}]   ;;  %s6847_s3 = inlined_call_operand.hbm [shape: f32[1,64], index: 3, kind: input, shape index: {}]   ;;  %s6848_s4 = inlined_call_operand.hbm [shape: f32[4,8,64], index: 4, kind: output, shape index: {}]  }
   0x1   :  { %11 = vsyncpa [#allocation3 + $0x1], 0 }
   0x2   :  { %12 = vsyncpa [#allocation6], 0 }
   0x3   :  { %13 = vsyncpa [#allocation9], 0 }
   0x4   :  { %14 = vsyncpa [#allocation4], 0 }
   0x5   :  { %16 = vsyncpa [#allocation4 + $0x1], 0  ;;  %s5647_s15 = smov 0   ;;  %s5649_s16 = smov 0  }
   0x6   :  { %s5651_s17 = smov 0   ;;  %s5653_s18 = smov 0  }
   0x7 LB: > { %s5668_s19 = sadd.s32 4294967295, %s5590_s18   ;;  %s4775_s20 = sadd.s32 4294967294, %s5590_s18   ;;  %s5590_s18 = sphi %s5653_s18, %s6871_s18   ;;  %s5586_s17 = sphi %s5651_s17, %s6870_s17   ;;  %s5582_s16 = sphi %s5649_s16, %s6869_s16   ;;  %s5578_s15 = sphi %s5647_s15, %s6868_s15  }
   0x8   : > { %p42_p0 = scmp.ne.s32.totalorder %s5582_s16, %s5578_s15  ;;  %p6849_p1 = scmp.eq.s32.totalorder %s5668_s19, 0 }
   0x9   : > { %p135_p3 = scmp.eq.s32.totalorder %s4775_s20, 1  ;;  %p4776_p5 = scmp.ge.s32.totalorder %s5590_s18, 1 }
   0xa   : > { %p5677_p4 = por %p6849_p1, %p42_p0  ;;  %p142_p7 = scmp.lt.s32.totalorder %s5590_s18, 3 }
   0xb   : > { %p5682_p6 = por %p135_p3, %p42_p0  ;;  %s5592_s24 = smov [#allocation5]  }
   0xc   : > { %s6852_s21 = scalar_select %p5677_p4, 1, 0 }
   0xd   : > { %s6853_s22 = scalar_select %p5682_p6, 1, 0 }
   0xe   : > { %p5687_p8 = pnand %p4776_p5, %p142_p7  ;;  %s154_s25 = sshll.u32 %s5592_s24, 4  ;;  %s5691_s25 = int_to_ptr.vmem [resolvable:$true] %s154_s25 }
   0xf   : > { %s5593_s27 = smov [#allocation7]   ;;  %s5594_s29 = smov [#allocation8]  }
  0x10   : > { %s6854_s23 = scalar_select %p5687_p8, 1, 0 }
  0x11   : > { %p5201_p9 = pneg %p5687_p8  ;;  %s167_s28 = sshll.u32 %s5593_s27, 4  ;;  %s5702_s28 = int_to_ptr.vmem [resolvable:$true] %s167_s28 }
  0x12   : > { %s5704_s30 = sshll.u32 %s5594_s29, 4  ;;  %s5402_s7 = scalar_lea.hbm %s6845_s1, 1536  ;;  %s182_s30 = int_to_ptr.vmem [resolvable:$true] %s5704_s30 }
  0x13   : > { %p5698_p11 = pnand %p5201_p9, %p6849_p1  ;;  %p5403_p12 = scmp.ne.s32.totalorder %s6845_s1, %s5402_s7 }
  0x14   : > { %p5409_p5 = scmp.lt.u32.totalorder %s5402_s7, %s6845_s1 }
  0x15   : > { %p5714_p13 = pneg %p5698_p11 }
  0x17   : > { %p5405_p0 = pnand %p5714_p13, %p5403_p12 }
  0x19   : > { %p5406_p3 = pneg %p5405_p0 }
  0x1b   : > { %p5411_p7 = pnand %p5409_p5, %p5406_p3 }
  0x1d   : > { %5414 = shalt.err (!%p5411_p7)
}
  0x1e   : > { %s5415_s13 = scalar_lea.vmem %s5691_s25, 1536  ;;  %p5423_p2 = scmp.lt.s32.totalorder %s5691_s25, %s5691_s25 }
  0x1f   : > { %p5416_p9 = scmp.ne.s32.totalorder %s5691_s25, %s5415_s13  ;;  %p5424_p6 = scmp.lt.s32.totalorder %s5415_s13, %s5415_s13 }
  0x21   : > { %p5418_p10 = pnand %p5416_p9, %p5714_p13  ;;  %p5425_p12 = por %p5424_p6, %p5423_p2 }
  0x23   : > { %p5419_p1 = pneg %p5418_p10 }
  0x25   : > { %p5426_p0 = pnand %p5425_p12, %p5419_p1 }
  0x27   : > { %5429 = shalt.err (!%p5426_p0)
}
  0x28   : > { %s5595_s14 = smov 64   ;;  %s5596_s20 = smov 4  }
  0x29   : > { %5204 = dma.hbm_to_vmem [thread:$0]  (!%p5698_p11), %s6845_s1, 1536, %s5691_s25, [#allocation6], %s5595_s14, %s5595_s14, %s5596_s20  }
  0x2a   : > { %s5430_s6 = scalar_lea.hbm %s6846_s2, 512 }
  0x2b   : > { %p5431_p2 = scmp.ne.s32.totalorder %s6846_s2, %s5430_s6  ;;  %p5437_p10 = scmp.lt.u32.totalorder %s5430_s6, %s6846_s2 }
  0x2d   : > { %p5433_p1 = pnand %p5431_p2, %p5714_p13 }
  0x2f   : > { %p5434_p6 = pneg %p5433_p1 }
  0x31   : > { %p5439_p3 = pnand %p5437_p10, %p5434_p6 }
  0x33   : > { %5442 = shalt.err (!%p5439_p3)
}
  0x34   : > { %s5443_s25 = scalar_lea.vmem %s5702_s28, 512  ;;  %p5451_p12 = scmp.lt.s32.totalorder %s5702_s28, %s5702_s28 }
  0x35   : > { %p5444_p5 = scmp.ne.s32.totalorder %s5702_s28, %s5443_s25  ;;  %p5452_p0 = scmp.lt.s32.totalorder %s5443_s25, %s5443_s25 }
  0x37   : > { %p5446_p7 = pnand %p5444_p5, %p5714_p13  ;;  %p5453_p2 = por %p5452_p0, %p5451_p12 }
  0x39   : > { %p5447_p9 = pneg %p5446_p7 }
  0x3b   : > { %p5454_p1 = pnand %p5453_p2, %p5447_p9 }
  0x3d   : > { %5457 = shalt.err (!%p5454_p1)
}
  0x3e   : > { %5207 = dma.hbm_to_vmem [thread:$0]  (!%p5698_p11), %s6846_s2, 512, %s5702_s28, [#allocation6], %s5595_s14, %s5595_s14, %s5596_s20  }
  0x3f   : > { %s5458_s29 = scalar_lea.hbm %s6847_s3, 16 }
  0x40   : > { %p5459_p6 = scmp.ne.s32.totalorder %s6847_s3, %s5458_s29  ;;  %p5465_p5 = scmp.lt.u32.totalorder %s5458_s29, %s6847_s3 }
  0x42   : > { %p5461_p10 = pnand %p5459_p6, %p5714_p13 }
  0x44   : > { %p5462_p3 = pneg %p5461_p10 }
  0x46   : > { %p5467_p7 = pnand %p5465_p5, %p5462_p3 }
  0x48   : > { %5470 = shalt.err (!%p5467_p7)
}
  0x49   : > { %s5471_s9 = scalar_lea.vmem %s182_s30, 16  ;;  %s5478_s28 = scalar_lea.vmem %s182_s30, 32 }
  0x4a   : > { %p5472_p9 = scmp.ne.s32.totalorder %s182_s30, %s5471_s9  ;;  %p5479_p2 = scmp.lt.s32.totalorder %s182_s30, %s182_s30 }
  0x4b   : > { %p5480_p1 = scmp.lt.s32.totalorder %s5478_s28, %s5471_s9 }
  0x4c   : > { %p5474_p12 = pnand %p5472_p9, %p5714_p13 }
  0x4d   : > { %p5481_p4 = por %p5480_p1, %p5479_p2 }
  0x4e   : > { %p5475_p0 = pneg %p5474_p12 }
  0x50   : > { %p5482_p8 = pnand %p5481_p4, %p5475_p0 }
  0x52   : > { %5485 = shalt.err (!%p5482_p8)
}
  0x53   : > { %5210 = dma.hbm_to_vmem [thread:$0]  (!%p5698_p11), %s6847_s3, 16, %s182_s30, [#allocation9]  }
  0x54   : > { %s5778_s10 = sadd.s32 1, %s5590_s18   ;;  %s29_s26 = sadd.s32 1, %s5586_s17 }
  0x55   : > { %s26_s11 = ssub.s32 %s5590_s18, %s5778_s10  ;;  %p36_p8 = scmp.ne.s32.totalorder %s5586_s17, %s5582_s16 }
  0x56   : > { %p27_p4 = scmp.eq.s32.totalorder %s26_s11, 0  ;;  %p37_p13 = scmp.eq.s32.totalorder %s5590_s18, 0 }
  0x57   : > { %p5222_p6 = scmp.lt.s32.totalorder %s5590_s18, 2  ;;  %p6857_p3 = scmp.eq.s32.totalorder %s5668_s19, 1 }
  0x58   : > { %s5788_s25 = scalar_select %p27_p4, %s5586_s17, %s29_s26  }
  0x59   : > { %p38_p10 = por %p37_p13, %p36_p8  ;;  %p5792_p5 = por %p6857_p3, %p36_p8 }
  0x5a   : > { %s192_s13 = sand.u32 1, %s5586_s17   ;;  %s4910_s24 = sshll.u32 %s5590_s18, 8 }
  0x5b   : > { %s4781_s30 = sshll.u32 %s192_s13, 4  ;;  %s5801_s5 = scalar_lea.hbm %s6844_s0, %s4910_s24 }
  0x5c   : > { %s196_s6 = scalar_lea.vmem [#allocation2], %s4781_s30  ;;  %p5803_p11 = pnand %p5222_p6, %p38_p10 }
  0x5d   : > { %s203_s7 = sshll.u32 %s196_s6, 4  ;;  %s5809_s9 = scalar_lea.sflag [#allocation3], %s192_s13  ;;  %s5807_s7 = int_to_ptr.vmem [resolvable:$true] %s203_s7 }
  0x5e   : > { %s5486_s28 = scalar_lea.hbm %s5801_s5, 256  ;;  %p5488_p9 = pneg %p5803_p11 }
  0x5f   : > { %p5487_p7 = scmp.ne.s32.totalorder %s5801_s5, %s5486_s28  ;;  %s5491_s11 = scalar_lea.hbm %s6844_s0, 512 }
  0x60   : > { %p5492_p2 = scmp.lt.u32.totalorder %s5801_s5, %s6844_s0  ;;  %p5493_p1 = scmp.lt.u32.totalorder %s5491_s11, %s5486_s28 }
  0x61   : > { %p5489_p12 = pnand %p5488_p9, %p5487_p7  ;;  %p5495_p8 = scmp.lt.u32.totalorder %s5486_s28, %s5801_s5 }
  0x62   : > { %p5494_p4 = por %p5493_p1, %p5492_p2 }
  0x63   : > { %p5490_p0 = pneg %p5489_p12 }
  0x64   : > { %p5496_p13 = por %p5495_p8, %p5494_p4 }
  0x66   : > { %p5497_p6 = pnand %p5496_p13, %p5490_p0 }
  0x68   : > { %5500 = shalt.err (!%p5497_p6)
}
  0x69   : > { %s5501_s13 = scalar_lea.vmem %s5807_s7, 256  ;;  %s5597_s30 = smov [#allocation2]  }
  0x6a   : > { %p5502_p10 = scmp.ne.s32.totalorder %s5807_s7, %s5501_s13  ;;  %s5506_s27 = sshll.u32 %s5597_s30, 4  ;;  %s5507_s27 = int_to_ptr.vmem [resolvable:$false] %s5506_s27 }
  0x6b   : > { %s5508_s29 = scalar_lea.vmem %s5507_s27, 512  ;;  %p5509_p12 = scmp.lt.s32.totalorder %s5807_s7, %s5507_s27 }
  0x6c   : > { %p5504_p3 = pnand %p5502_p10, %p5488_p9  ;;  %p5510_p2 = scmp.lt.s32.totalorder %s5508_s29, %s5501_s13 }
  0x6e   : > { %p5505_p7 = pneg %p5504_p3  ;;  %p5511_p1 = por %p5510_p2, %p5509_p12 }
  0x70   : > { %p5512_p4 = pnand %p5511_p1, %p5505_p7 }
  0x72   : > { %5515 = shalt.err (!%p5512_p4)
}
  0x73   : > { %s5598_s6 = smov 128   ;;  %s5599_s28 = smov 8  }
  0x74   : > { %5214 = dma.hbm_to_vmem [thread:$0]  (!%p5803_p11), %s5801_s5, 256, %s5807_s7, %s5809_s9, %s5598_s6, %s5598_s6, %s5599_s28  }
  0x75   : > { %p6860_p9 = scmp.ne.s32.totalorder %s6854_s23, 0 }
  0x76   : > { %s5840_s14 = sand.u32 (!%p6860_p9), 1, %s5582_s16   ;;  %p6861_p0 = scmp.ne.s32.totalorder (!%p6860_p9), %s6852_s21, 0 }
  0x77   : > { %215 = sbr.rel (%p6860_p9) target bundleno = 1871 (0x74f), region = 36  ;;  %s4785_s20 = sshll.u32 (!%p6860_p9), %s5840_s14, 4 }
  0x78   : > { %s218_s11 = scalar_lea.sflag (!%p6860_p9), [#allocation3], %s5840_s14  ;;  %s5846_s26 = scalar_lea.vmem (!%p6860_p9), [#allocation2], %s4785_s20 }
  0x7e   : > { %5561 = dma.done.wait (%p6861_p0), %s218_s11, 256  }
  0x7f   : > { %5563 = vsyncadd (%p6861_p0), %s218_s11, 4294967040  ;;  %p6862_p11 = scmp.eq.s32.totalorder %s5668_s19, 0 }
  0x81   : > { %5565 = dma.done.wait (%p6862_p11), [#allocation6], 2048   ;;  %p6863_p8 = pmov %p6862_p11 }
  0x83   : > { %5567 = vsyncadd (%p6863_p8), [#allocation6], 4294965248  ;;  %p6864_p13 = pmov %p6863_p8 }
  0x84   : > { %p6865_p6 = pmov %p6863_p8 }
  0x85   : > { %5569 = dma.done.wait (%p6864_p13), [#allocation9], 16  }
  0x86   : > { %5571 = vsyncadd (%p6865_p6), [#allocation9], 4294967280  ;;  %v5600_v0 = vmov 0   ;;  %vm348_vm0 = vcmask 523264   ;;  %v5322_v1 = vld [vmem:[#allocation5] sm:$0xff]   ;;  %v5323_v3 = vld [vmem:[#allocation5 + $0x8] sm:$0xff]   ;;  %v482_v47 = vlaneseq }
  0x87   : > { %388 = vmatprep.subr.bf16.mxu0 %v5600_v0  ;;  %420 = vmatprep.mubr.bf16.mxu0 %v5600_v0  ;;  %v353_v2 = vsel %vm348_vm0, %v5322_v1, 0  ;;  %v356_v4 = vsel %vm348_vm0, %v5323_v3, 0  ;;  %v5324_v5 = vld [vmem:[#allocation5 + $0x10] sm:$0xff]   ;;  %v5325_v7 = vld [vmem:[#allocation5 + $0x18] sm:$0xff]   ;;  %v5326_v9 = vld [vmem:[#allocation5 + $0x20] sm:$0xff]   ;;  %s5601_s21 = smov 104  }
  0x88   : > { %389 = vmatpush1.bf16.xpose.msra.mxu0 %v353_v2  ;;  %v359_v6 = vsel %vm348_vm0, %v5324_v5, 0  ;;  %v362_v8 = vsel %vm348_vm0, %v5325_v7, 0  ;;  %v365_v10 = vsel %vm348_vm0, %v5326_v9, 0  ;;  %v5327_v11 = vld [vmem:[#allocation5 + $0x28] sm:$0xff]   ;;  %v5328_v13 = vld [vmem:[#allocation5 + $0x30] sm:$0xff]   ;;  %v5329_v15 = vld [vmem:[#allocation5 + $0x38] sm:$0xff]  }
  0x89   : > { %390 = vmatprep.subr.bf16.mxu0 %v5600_v0  ;;  %v368_v12 = vsel %vm348_vm0, %v5327_v11, 0  ;;  %v371_v14 = vsel %vm348_vm0, %v5328_v13, 0  ;;  %v374_v16 = vsel %vm348_vm0, %v5329_v15, 0  ;;  %v5330_v17 = vld [vmem:[#allocation5 + $0x40] sm:$0xff]   ;;  %v5331_v19 = vld [vmem:[#allocation5 + $0x48] sm:$0xff]   ;;  %v5332_v21 = vld [vmem:[#allocation5 + $0x50] sm:$0xff]  }
  0x8a   : > { %v377_v18 = vsel %vm348_vm0, %v5330_v17, 0  ;;  %v380_v20 = vsel %vm348_vm0, %v5331_v19, 0  ;;  %v383_v22 = vsel %vm348_vm0, %v5332_v21, 0  ;;  %v5333_v23 = vld [vmem:[#allocation5 + $0x58] sm:$0xff]   ;;  %v261_v25 = vld [vmem:[%s5846_s26] sm:$0xff]  ;;  %s5602_s23 = smov 120  }
  0x8b   : > { %v386_v24 = vsel %vm348_vm0, %v5333_v23, 0  ;;  %v262_v26 = vld [vmem:[%s5846_s26 + $0x8] sm:$0xff]  ;;  %s5603_s5 = smov 112   ;;  %s5604_s7 = smov 64   ;;  %v5609_v41 = vmov 0.0   ;;  %v483_v52 = vshrl.u32 %v482_v47, 7 }
  0x8c   : > { %v263_v27 = vpack.c.bf16 %v262_v26, %v261_v25  ;;  %s5605_s8 = smov 88   ;;  %s5606_s9 = smov 96   ;;  %4981 = vmatprep.subr.bf16.mxu1 %v5609_v41  ;;  %v5610_v45 = vmov 1983009808   ;;  %v5611_v49 = vmov 1934713408  }
  0x8d   : > { %s5607_s24 = smov 72   ;;  %s5608_s13 = smov 80   ;;  %v480_v46 = vunpack.c.l.s4 %v5610_v45  ;;  %v544_v50 = vunpack.c.l.s4 %v5611_v49  ;;  %vm5612_vm1 = vmmov 0   ;;  %vm2279_vm2 = vcmask 64512  }
  0x8e   : > { %4983 = vmatprep.mubr.msk.bf16.mxu1 %vm5612_vm1, %v5609_v41  ;;  %vm3179_vm3 = vcmask 1043456   ;;  %s5613_s30 = smov 16   ;;  %s5614_s27 = smov 8   ;;  %vm4547_vm4 = vcmask 130048   ;;  %vm4550_vm5 = vcmask 195584   ;;  %vm4553_vm6 = vcmask 261120  }
  0x8f   : > { %v481_v51 = vunpack.c.0.s8 %v480_v46  ;;  %v545_v55 = vunpack.c.0.s8 %v544_v50  ;;  %s5615_s29 = smov 24   ;;  %s5616_s6 = smov 40   ;;  %vm4556_vm7 = vcmask 326656   ;;  %vm4559_vm8 = vcmask 392192  }
  0x90   : > { %391 = vmatpush1.bf16.xpose.msra.mxu0 %v356_v4  ;;  %s5617_s28 = smov 32   ;;  %s5618_s11 = smov 56   ;;  %vm4562_vm9 = vcmask 457728  }
  0x91   : > { %392 = vmatprep.subr.bf16.mxu0 %v5600_v0  ;;  %v5927_v56 = vsub.s32 %v481_v51, %v483_v52  ;;  %v5933_v62 = vsub.s32 %v545_v55, %v483_v52  ;;  %s5619_s26 = smov 48  }
  0x98   : > { %393 = vmatpush1.bf16.xpose.msra.mxu0 %v359_v6 }
  0x99   : > { %394 = vmatprep.subr.bf16.mxu0 %v5600_v0 }
  0xa0   : > { %395 = vmatpush1.bf16.xpose.msra.mxu0 %v362_v8 }
  0xa1   : > { %396 = vmatprep.subr.bf16.mxu0 %v5600_v0 }
  0xa8   : > { %397 = vmatpush1.bf16.xpose.msra.mxu0 %v365_v10 }
  0xa9   : > { %398 = vmatprep.subr.bf16.mxu0 %v5600_v0 }
  0xb0   : > { %399 = vmatpush1.bf16.xpose.msra.mxu0 %v368_v12 }
  0xb1   : > { %400 = vmatprep.subr.bf16.mxu0 %v5600_v0 }
  0xb8   : > { %401 = vmatpush1.bf16.xpose.msra.mxu0 %v371_v14 }
  0xb9   : > { %402 = vmatprep.subr.bf16.mxu0 %v5600_v0 }
  0xc0   : > { %403 = vmatpush1.bf16.xpose.msra.mxu0 %v374_v16 }
  0xc1   : > { %404 = vmatprep.subr.bf16.mxu0 %v5600_v0 }
  0xc8   : > { %405 = vmatpush1.bf16.xpose.msra.mxu0 %v377_v18 }
  0xc9   : > { %406 = vmatprep.subr.bf16.mxu0 %v5600_v0 }
  0xd0   : > { %407 = vmatpush1.bf16.xpose.msra.mxu0 %v380_v20 }
  0xd1   : > { %408 = vmatprep.subr.bf16.mxu0 %v5600_v0 }
  0xd8   : > { %409 = vmatpush1.bf16.xpose.msra.mxu0 %v383_v22 }
  0xd9   : > { %410 = vmatprep.subr.bf16.mxu0 %v5600_v0 }
  0xe0   : > { %411 = vmatpush1.bf16.xpose.msra.mxu0 %v386_v24 }
  0xe1   : > { %5077 = vmatprep.subr.bf16.mxu0 %v5609_v41 }
  0xe7   : > { %4802 = vmatmul.mubr.msk.bf16.vlgmr.msra.gmra.mrb[0].mxu0 %vm348_vm0, %v263_v27 }
  0xe8   : > { %5079 = vmatprep.mubr.msk.bf16.mxu0 %vm5612_vm1, %v5609_v41 }
 0x1ba   : > { %v422_v28 = vpop.f32.mrb[0].mxu0 }
 0x1bb   : > { %1047 = vrot.lane.b32.xlu1 %v422_v28, %s5601_s21  ;;  %1039 = vrot.lane.b32.xlu0 %v422_v28, %s5602_s23  ;;  %v5877_v29 = vpop.f32.mrb[1].mxu0  ;;  %v5889_v32 = vmul.f32 0.35355338, %v422_v28 }
 0x1bc   : > { %v426_v30 = vpop.f32.mrb[2].mxu0 }
 0x1bd   : > { %v5879_v31 = vpop.f32.mrb[3].mxu0  ;;  %v5912_v42 = vmul.f32 0.35355338, %v426_v30 }
 0x1bf   : > { %1043 = vrot.lane.b32.xlu0 %v422_v28, %s5603_s5  ;;  %1041 = vrot.lane.b32.xlu1 %v426_v30, %s5602_s23 }
 0x1c3   : > { %1045 = vrot.lane.b32.xlu0 %v426_v30, %s5603_s5  ;;  %1049 = vrot.lane.b32.xlu1 %v426_v30, %s5601_s21 }
 0x1c7   : > { %1067 = vrot.lane.b32.xlu0 %v422_v28, %s5604_s7  ;;  %1055 = vrot.lane.b32.xlu1 %v422_v28, %s5605_s8 }
 0x1cb   : > { %1051 = vrot.lane.b32.xlu0 %v422_v28, %s5606_s9  ;;  %1063 = vrot.lane.b32.xlu1 %v422_v28, %s5607_s24 }
 0x1cf   : > { %1059 = vrot.lane.b32.xlu0 %v422_v28, %s5608_s13  ;;  %441 = vrot.lane.b32.xlu1 %v5889_v32, %s5603_s5 }
 0x1d3   : > { %435 = vrot.lane.b32.xlu0 %v5889_v32, %s5602_s23  ;;  %1069 = vrot.lane.b32.xlu1 %v426_v30, %s5604_s7 }
 0x1d7   : > { %447 = vrot.lane.b32.xlu0 %v5889_v32, %s5601_s21  ;;  %1053 = vrot.lane.b32.xlu1 %v426_v30, %s5606_s9 }
 0x1db   : > { %1057 = vrot.lane.b32.xlu0 %v426_v30, %s5605_s8 }
 0x22d   : > { %v1048_v33 = vpop.permute.xlu1 %1047  ;;  %v1040_v34 = vpop.permute.xlu0 %1039 }
 0x22e   : > { %1071 = vrot.lane.b32.xlu1 %v1040_v34, %s5604_s7 }
 0x231   : > { %v1044_v35 = vpop.permute.xlu0 %1043  ;;  %v1042_v36 = vpop.permute.xlu1 %1041 }
 0x232   : > { %1075 = vrot.lane.b32.xlu0 %v1044_v35, %s5604_s7  ;;  %1079 = vrot.lane.b32.xlu1 %v1048_v33, %s5604_s7 }
 0x235   : > { %v1046_v37 = vpop.permute.xlu0 %1045  ;;  %v1050_v38 = vpop.permute.xlu1 %1049 }
 0x236   : > { %1061 = vrot.lane.b32.xlu1 %v426_v30, %s5608_s13  ;;  %1073 = vrot.lane.b32.xlu0 %v1042_v36, %s5604_s7 }
 0x239   : > { %v5906_v39 = vpop.permute.xlu0 %1067  ;;  %v1056_v40 = vpop.permute.xlu1 %1055 }
 0x23a   : > { %1077 = vrot.lane.b32.xlu1 %v1046_v37, %s5604_s7  ;;  %1081 = vrot.lane.b32.xlu0 %v1050_v38, %s5604_s7 }
 0x23d   : > { %v1052_v43 = vpop.permute.xlu0 %1051  ;;  %v1064_v44 = vpop.permute.xlu1 %1063 }
 0x23e   : > { %1065 = vrot.lane.b32.xlu0 %v426_v30, %s5607_s24  ;;  %437 = vrot.lane.b32.xlu1 %v5912_v42, %s5602_s23 }
 0x241   : > { %v1060_v48 = vpop.permute.xlu0 %1059  ;;  %v442_v53 = vpop.permute.xlu1 %441 }
 0x242   : > { %443 = vrot.lane.b32.xlu0 %v5912_v42, %s5603_s5  ;;  %449 = vrot.lane.b32.xlu1 %v5912_v42, %s5601_s21  ;;  %v477_v57 = vcombine.low %v5889_v32, %v442_v53  ;;  %v478_v58 = vcombine.high %v5889_v32, %v442_v53 }
 0x244   : > { %v485_v63 = vrot.slane %v477_v57, %v5927_v56  ;;  %v492_v0 = vrot.slane %v478_v58, %v5927_v56 }
 0x245   : > { %v436_v54 = vpop.permute.xlu0 %435  ;;  %v5941_v7 = vpop.permute.xlu1 %1069 }
 0x246   : > { %1083 = vrot.lane.b32.xlu0 %v1052_v43, %s5604_s7  ;;  %1087 = vrot.lane.b32.xlu1 %v1056_v40, %s5604_s7 }
 0x249   : > { %v448_v59 = vpop.permute.xlu0 %447  ;;  %v1054_v20 = vpop.permute.xlu1 %1053 }
 0x24a   : > { %v493_v60 = vcombine.low %v436_v54, %v448_v59  ;;  %v494_v61 = vcombine.high %v436_v54, %v448_v59  ;;  %1091 = vrot.lane.b32.xlu0 %v1060_v48, %s5604_s7  ;;  %1095 = vrot.lane.b32.xlu1 %v1064_v44, %s5604_s7 }
 0x24c   : > { %v501_v1 = vrot.slane %v493_v60, %v5927_v56  ;;  %v508_v2 = vrot.slane %v494_v61, %v5927_v56 }
 0x24d   : > { %v1058_v23 = vpop.permute.xlu0 %1057 }
 0x24e   : > { %v541_v3 = vcombine.low %v485_v63, %v501_v1  ;;  %v542_v4 = vcombine.high %v485_v63, %v501_v1  ;;  %v557_v5 = vcombine.low %v492_v0, %v508_v2  ;;  %v558_v6 = vcombine.high %v492_v0, %v508_v2  ;;  %453 = vrot.lane.b32.xlu0 %v5889_v32, %s5606_s9 }
 0x24f   : > { %459 = vrot.lane.b32.xlu1 %v5889_v32, %s5605_s8 }
 0x250   : > { %v549_v8 = vrot.slane %v541_v3, %v5933_v62  ;;  %v556_v9 = vrot.slane %v542_v4, %v5933_v62  ;;  %v565_v10 = vrot.slane %v557_v5, %v5933_v62  ;;  %v572_v11 = vrot.slane %v558_v6, %v5933_v62 }
 0x252   : > { %v4803_v12 = vcombine.low %v549_v8, %v556_v9  ;;  %v4805_v13 = vcombine.high %v549_v8, %v556_v9  ;;  %v4807_v14 = vcombine.low %v565_v10, %v572_v11  ;;  %v4809_v15 = vcombine.high %v565_v10, %v572_v11  ;;  %465 = vrot.lane.b32.xlu0 %v5889_v32, %s5608_s13 }
 0x253   : > { %471 = vrot.lane.b32.xlu1 %v5889_v32, %s5607_s24 }
 0x254   : > { %v757_v16 = vrot.slane %v4803_v12, %v5927_v56  ;;  %v773_v17 = vrot.slane %v4805_v13, %v5927_v56  ;;  %v789_v18 = vrot.slane %v4807_v14, %v5927_v56  ;;  %v805_v19 = vrot.slane %v4809_v15, %v5927_v56 }
 0x256   : > { %v814_v21 = vcombine.high %v757_v16, %v773_v17  ;;  %v846_v22 = vcombine.high %v789_v18, %v805_v19  ;;  %1085 = vrot.lane.b32.xlu0 %v1054_v20, %s5604_s7  ;;  %v813_v24 = vcombine.low %v757_v16, %v773_v17  ;;  %v845_v25 = vcombine.low %v789_v18, %v805_v19 }
 0x257   : > { %1089 = vrot.lane.b32.xlu1 %v1058_v23, %s5604_s7 }
 0x258   : > { %v821_v26 = vrot.slane %v813_v24, %v5933_v62  ;;  %v853_v27 = vrot.slane %v845_v25, %v5933_v62  ;;  %v828_v28 = vrot.slane %v814_v21, %v5933_v62  ;;  %v860_v30 = vrot.slane %v846_v22, %v5933_v62 }
 0x25a   : > { %v5963_v32 = vcombine.low %v821_v26, %v853_v27  ;;  %v5965_v33 = vcombine.high %v821_v26, %v853_v27  ;;  %v5967_v34 = vcombine.low %v828_v28, %v860_v30  ;;  %v5969_v35 = vcombine.high %v828_v28, %v860_v30 }
 0x2a0   : > { %v1072_v36 = vpop.permute.xlu1 %1071 }
 0x2a4   : > { %v1076_v37 = vpop.permute.xlu0 %1075  ;;  %v1080_v38 = vpop.permute.xlu1 %1079 }
 0x2a5   : > { %v1115_v40 = vcombine.low %v5906_v39, %v1076_v37  ;;  %v1116_v43 = vcombine.high %v5906_v39, %v1076_v37  ;;  %v1131_v44 = vcombine.low %v1072_v36, %v1080_v38  ;;  %v1132_v45 = vcombine.high %v1072_v36, %v1080_v38 }
 0x2a7   : > { %v1123_v46 = vrot.slane %v1115_v40, %v5927_v56  ;;  %v1130_v47 = vrot.slane %v1116_v43, %v5927_v56  ;;  %v1139_v48 = vrot.slane %v1131_v44, %v5927_v56  ;;  %v1146_v49 = vrot.slane %v1132_v45, %v5927_v56 }
 0x2a8   : > { %v1074_v50 = vpop.permute.xlu0 %1073  ;;  %v1062_v51 = vpop.permute.xlu1 %1061 }
 0x2a9   : > { %v1179_v52 = vcombine.low %v1123_v46, %v1139_v48  ;;  %v1180_v53 = vcombine.high %v1123_v46, %v1139_v48  ;;  %v1195_v54 = vcombine.low %v1130_v47, %v1146_v49  ;;  %v1196_v55 = vcombine.high %v1130_v47, %v1146_v49  ;;  %1093 = vrot.lane.b32.xlu0 %v1062_v51, %s5604_s7 }
 0x2ab   : > { %v1187_v39 = vrot.slane %v1179_v52, %v5933_v62  ;;  %v1194_v57 = vrot.slane %v1180_v53, %v5933_v62  ;;  %v1203_v58 = vrot.slane %v1195_v54, %v5933_v62  ;;  %v1210_v59 = vrot.slane %v1196_v55, %v5933_v62 }
 0x2ac   : > { %v1082_v60 = vpop.permute.xlu0 %1081  ;;  %v1078_v61 = vpop.permute.xlu1 %1077 }
 0x2ad   : > { %v4819_v63 = vcombine.low %v1187_v39, %v1194_v57  ;;  %v4821_v0 = vcombine.high %v1187_v39, %v1194_v57  ;;  %v4823_v1 = vcombine.low %v1203_v58, %v1210_v59  ;;  %v4825_v2 = vcombine.high %v1203_v58, %v1210_v59  ;;  %455 = vrot.lane.b32.xlu0 %v5912_v42, %s5606_s9 }
 0x2ae   : > { %v1267_v3 = vcombine.low %v1074_v50, %v1082_v60  ;;  %v1268_v4 = vcombine.high %v1074_v50, %v1082_v60  ;;  %v1251_v5 = vcombine.low %v5941_v7, %v1078_v61  ;;  %v1252_v6 = vcombine.high %v5941_v7, %v1078_v61 }
 0x2af   : > { %v5987_v8 = vrot.slane %v4819_v63, %v5927_v56  ;;  %v5990_v9 = vrot.slane %v4821_v0, %v5927_v56  ;;  %v5993_v10 = vrot.slane %v4823_v1, %v5927_v56  ;;  %v5996_v11 = vrot.slane %v4825_v2, %v5927_v56 }
 0x2b0   : > { %v1275_v12 = vrot.slane %v1267_v3, %v5927_v56  ;;  %v1282_v13 = vrot.slane %v1268_v4, %v5927_v56  ;;  %v1259_v14 = vrot.slane %v1251_v5, %v5927_v56  ;;  %v1266_v7 = vrot.slane %v1252_v6, %v5927_v56  ;;  %v1066_v15 = vpop.permute.xlu0 %1065  ;;  %v438_v16 = vpop.permute.xlu1 %437 }
 0x2b1   : > { %467 = vrot.lane.b32.xlu0 %v5912_v42, %s5608_s13  ;;  %1097 = vrot.lane.b32.xlu1 %v1066_v15, %s5604_s7  ;;  %v1451_v17 = vcombine.low %v5987_v8, %v5990_v9  ;;  %v1483_v18 = vcombine.low %v5993_v10, %v5996_v11 }
 0x2b2   : > { %v1315_v19 = vcombine.low %v1259_v14, %v1275_v12  ;;  %v1316_v20 = vcombine.high %v1259_v14, %v1275_v12  ;;  %v1331_v21 = vcombine.low %v1266_v7, %v1282_v13  ;;  %v1332_v22 = vcombine.high %v1266_v7, %v1282_v13 }
 0x2b3   : > { %v6010_v23 = vrot.slane %v1451_v17, %v5933_v62  ;;  %v6013_v24 = vrot.slane %v1483_v18, %v5933_v62 }
 0x2b4   : > { %v1323_v25 = vrot.slane %v1315_v19, %v5933_v62  ;;  %v1330_v26 = vrot.slane %v1316_v20, %v5933_v62  ;;  %v1339_v27 = vrot.slane %v1331_v21, %v5933_v62  ;;  %v1346_v28 = vrot.slane %v1332_v22, %v5933_v62  ;;  %v444_v30 = vpop.permute.xlu0 %443  ;;  %v450_v36 = vpop.permute.xlu1 %449 }
 0x2b5   : > { %v613_v37 = vcombine.low %v5912_v42, %v444_v30  ;;  %v614_v38 = vcombine.high %v5912_v42, %v444_v30  ;;  %v629_v40 = vcombine.low %v438_v16, %v450_v36  ;;  %v630_v43 = vcombine.high %v438_v16, %v450_v36  ;;  %1677 = vrot.lane.b32.xlu0 %v5877_v29, %s5602_s23 }
 0x2b6   : > { %v4827_v44 = vcombine.low %v1323_v25, %v1330_v26  ;;  %v4829_v45 = vcombine.high %v1323_v25, %v1330_v26  ;;  %v4831_v46 = vcombine.low %v1339_v27, %v1346_v28  ;;  %v4833_v47 = vcombine.high %v1339_v27, %v1346_v28  ;;  %461 = vrot.lane.b32.xlu1 %v5912_v42, %s5605_s8 }
 0x2b7   : > { %v621_v48 = vrot.slane %v613_v37, %v5927_v56  ;;  %v628_v49 = vrot.slane %v614_v38, %v5927_v56  ;;  %v637_v50 = vrot.slane %v629_v40, %v5927_v56  ;;  %v644_v51 = vrot.slane %v630_v43, %v5927_v56 }
 0x2b8   : > { %v6030_v52 = vrot.slane %v4827_v44, %v5927_v56  ;;  %v6033_v53 = vrot.slane %v4829_v45, %v5927_v56  ;;  %v6036_v54 = vrot.slane %v4831_v46, %v5927_v56  ;;  %v6039_v55 = vrot.slane %v4833_v47, %v5927_v56  ;;  %v1084_v39 = vpop.permute.xlu0 %1083  ;;  %v1088_v57 = vpop.permute.xlu1 %1087 }
 0x2b9   : > { %v677_v58 = vcombine.low %v621_v48, %v637_v50  ;;  %v678_v59 = vcombine.high %v621_v48, %v637_v50  ;;  %v693_v60 = vcombine.low %v628_v49, %v644_v51  ;;  %v694_v61 = vcombine.high %v628_v49, %v644_v51  ;;  %1683 = vrot.lane.b32.xlu0 %v5877_v29, %s5603_s5 }
 0x2ba   : > { %473 = vrot.lane.b32.xlu1 %v5912_v42, %s5607_s24  ;;  %v1515_v63 = vcombine.low %v6010_v23, %v6013_v24  ;;  %v1587_v0 = vcombine.low %v6030_v52, %v6033_v53  ;;  %v1619_v1 = vcombine.low %v6036_v54, %v6039_v55  ;;  %v1021_v51 = vpack.c.bf16 %v5963_v32, %v5963_v32 }
 0x2bb   : > { %v685_v2 = vrot.slane %v677_v58, %v5933_v62  ;;  %v692_v3 = vrot.slane %v678_v59, %v5933_v62  ;;  %v701_v4 = vrot.slane %v693_v60, %v5933_v62  ;;  %v708_v5 = vrot.slane %v694_v61, %v5933_v62 }
 0x2bc   : > { %v1659_v6 = vpack.c.bf16 %v1515_v63, %v1515_v63  ;;  %v1092_v42 = vpop.permute.xlu0 %1091  ;;  %v1096_v12 = vpop.permute.xlu1 %1095  ;;  %v6056_v13 = vrot.slane %v1587_v0, %v5933_v62  ;;  %v6059_v14 = vrot.slane %v1619_v1, %v5933_v62  ;;  %v1516_v0 = vcombine.high %v6010_v23, %v6013_v24 }
 0x2bd   : > { %v4811_v7 = vcombine.low %v685_v2, %v692_v3  ;;  %v4813_v15 = vcombine.high %v685_v2, %v692_v3  ;;  %v4815_v16 = vcombine.low %v701_v4, %v708_v5  ;;  %v4817_v17 = vcombine.high %v701_v4, %v708_v5  ;;  %1689 = vrot.lane.b32.xlu0 %v5877_v29, %s5601_s21 }
 0x2be   : > { %v2284_v18 = vsel %vm2279_vm2, %v1659_v6, 0  ;;  %v1147_v19 = vcombine.low %v1084_v39, %v1092_v42  ;;  %v1148_v20 = vcombine.high %v1084_v39, %v1092_v42  ;;  %v1163_v21 = vcombine.low %v1088_v57, %v1096_v12  ;;  %1679 = vrot.lane.b32.xlu1 %v5879_v31, %s5602_s23 }
 0x2bf   : > { %v6067_v22 = vrot.slane %v4811_v7, %v5927_v56  ;;  %v6070_v25 = vrot.slane %v4813_v15, %v5927_v56  ;;  %v6073_v26 = vrot.slane %v4815_v16, %v5927_v56  ;;  %v6076_v27 = vrot.slane %v4817_v17, %v5927_v56  ;;  %4982 = vmatpush3.bf16.xpose.msra.mxu1 %v2284_v18 }
 0x2c0   : > { %v1155_v28 = vrot.slane %v1147_v19, %v5927_v56  ;;  %v1164_v30 = vcombine.high %v1088_v57, %v1096_v12  ;;  %v1171_v36 = vrot.slane %v1163_v21, %v5927_v56  ;;  %v454_v37 = vpop.permute.xlu0 %453  ;;  %4987 = vmatprep.subr.bf16.mxu1 %v5609_v41  ;;  %v1162_v44 = vrot.slane %v1148_v20, %v5927_v56 }
 0x2c1   : > { %v949_v38 = vcombine.low %v6067_v22, %v6070_v25  ;;  %v981_v40 = vcombine.low %v6073_v26, %v6076_v27  ;;  %v460_v43 = vpop.permute.xlu1 %459  ;;  %1697 = vrot.lane.b32.xlu0 %v5879_v31, %s5606_s9  ;;  %v1651_v46 = vcombine.low %v6056_v13, %v6059_v14  ;;  %v1661_v7 = vpack.c.bf16 %v1516_v0, %v1516_v0 }
 0x2c2   : > { %v1178_v45 = vrot.slane %v1164_v30, %v5927_v56  ;;  %1685 = vrot.lane.b32.xlu1 %v5879_v31, %s5603_s5  ;;  %v1211_v49 = vcombine.low %v1155_v28, %v1171_v36  ;;  %v1212_v50 = vcombine.high %v1155_v28, %v1171_v36  ;;  %v1652_v21 = vcombine.high %v6056_v13, %v6059_v14  ;;  %s4911_s5 = sshll.u32 %s5668_s19, 8  ;;  %s4660_s19 = scalar_lea.sflag [#allocation4], %s5840_s14 }
 0x2c3   : > { %v6094_v47 = vrot.slane %v949_v38, %v5933_v62  ;;  %v6097_v48 = vrot.slane %v981_v40, %v5933_v62  ;;  %v1660_v57 = vpack.c.bf16 %v1651_v46, %v1651_v46  ;;  %v1452_v28 = vcombine.high %v5987_v8, %v5990_v9 }
 0x2c4   : > { %v466_v39 = vpop.permute.xlu0 %465  ;;  %v1227_v61 = vcombine.low %v1162_v44, %v1178_v45  ;;  %v1228_v63 = vcombine.high %v1162_v44, %v1178_v45  ;;  %v1219_v4 = vrot.slane %v1211_v49, %v5933_v62  ;;  %v1226_v5 = vrot.slane %v1212_v50, %v5933_v62 }
 0x2c5   : > { %v509_v58 = vcombine.low %v454_v37, %v466_v39  ;;  %v510_v59 = vcombine.high %v454_v37, %v466_v39  ;;  %v472_v60 = vpop.permute.xlu1 %471  ;;  %1707 = vrot.lane.b32.xlu0 %v5877_v29, %s5608_s13  ;;  %v2330_v1 = vsel %vm2279_vm2, %v1660_v57, 0  ;;  %v1013_v3 = vcombine.low %v6094_v47, %v6097_v48 }
 0x2c6   : > { %4984 = vmatmul.mubr.msk.bf16.vlgmr.msra.gmra.mrb[0].mxu1 %vm2279_vm2, %v1021_v51  ;;  %v525_v32 = vcombine.low %v460_v43, %v472_v60  ;;  %1691 = vrot.lane.b32.xlu1 %v5879_v31, %s5601_s21  ;;  %v526_v24 = vcombine.high %v460_v43, %v472_v60  ;;  %v1235_v42 = vrot.slane %v1227_v61, %v5933_v62  ;;  %v2376_v44 = vsel %vm2279_vm2, %v1661_v7, 0  ;;  %s257_s21 = scalar_lea.vmem [#allocation10], %s4785_s20  ;;  %s6798_s20 = scalar_lea.hbm %s6848_s4, %s4911_s5 }
 0x2c7   : > { %v517_v2 = vrot.slane %v509_v58, %v5927_v56  ;;  %4989 = vmatprep.mubr.msk.bf16.mxu1 %vm5612_vm1, %v5609_v41  ;;  %4988 = vmatpush3.bf16.xpose.msra.mxu1 %v2330_v1  ;;  %v524_v23 = vrot.slane %v510_v59, %v5927_v56  ;;  %v1242_v12 = vrot.slane %v1228_v63, %v5933_v62  ;;  %s4673_s23 = sshll.u32 %s257_s21, 4  ;;  %s6792_s23 = int_to_ptr.vmem [resolvable:$true] %s4673_s23 }
 0x2c8   : > { %v533_v6 = vrot.slane %v525_v32, %v5927_v56  ;;  %4993 = vmatprep.subr.bf16.mxu1 %v5609_v41  ;;  %v540_v15 = vrot.slane %v526_v24, %v5927_v56  ;;  %v1022_v18 = vpack.c.bf16 %v1013_v3, %v1013_v3  ;;  %v4820_v19 = vcombine.low %v1219_v4, %v1226_v5 }
 0x2c9   : > { %v4822_v20 = vcombine.high %v1219_v4, %v1226_v5  ;;  %v4824_v40 = vcombine.low %v1235_v42, %v1242_v12  ;;  %v4826_v43 = vcombine.high %v1235_v42, %v1242_v12  ;;  %v1484_v45 = vcombine.high %v5993_v10, %v5996_v11 }
 0x2ca   : > { %v573_v16 = vcombine.low %v517_v2, %v533_v6  ;;  %v574_v17 = vcombine.high %v517_v2, %v533_v6  ;;  %1695 = vrot.lane.b32.xlu1 %v5877_v29, %s5606_s9  ;;  %v589_v37 = vcombine.low %v524_v23, %v540_v15  ;;  %v590_v38 = vcombine.high %v524_v23, %v540_v15  ;;  %s5516_s9 = scalar_lea.vmem %s6792_s23, 256 }
 0x2cb   : > { %v1402_v8 = vrot.slane %v4820_v19, %v5927_v56  ;;  %v1418_v9 = vrot.slane %v4822_v20, %v5927_v56  ;;  %v1662_v50 = vpack.c.bf16 %v1652_v21, %v1652_v21  ;;  %v1434_v57 = vrot.slane %v4824_v40, %v5927_v56  ;;  %p5517_p10 = scmp.ne.s32.totalorder %s6792_s23, %s5516_s9 }
 0x2cc   : > { %v581_v30 = vrot.slane %v573_v16, %v5933_v62  ;;  %v588_v36 = vrot.slane %v574_v17, %v5933_v62  ;;  %v597_v46 = vrot.slane %v589_v37, %v5933_v62  ;;  %v604_v13 = vrot.slane %v590_v38, %v5933_v62 }
 0x2cd   : > { %v1450_v58 = vrot.slane %v4826_v43, %v5927_v56  ;;  %v1466_v59 = vrot.slane %v1452_v28, %v5933_v62  ;;  %v1498_v60 = vrot.slane %v1484_v45, %v5933_v62  ;;  %v1023_v2 = vpack.c.bf16 %v5965_v33, %v5965_v33  ;;  %p5518_p3 = pnand %p5517_p10, %p5792_p5 }
 0x2ce   : > { %v4804_v14 = vcombine.low %v581_v30, %v588_v36  ;;  %v4806_v49 = vcombine.high %v581_v30, %v588_v36  ;;  %4990 = vmatmul.mubr.msk.bf16.vlgmr.msra.gmra.mrb[4].mxu1 %vm2279_vm2, %v1022_v18  ;;  %1701 = vrot.lane.b32.xlu1 %v5877_v29, %s5605_s8  ;;  %v4808_v11 = vcombine.low %v597_v46, %v604_v13  ;;  %v2422_v4 = vsel %vm2279_vm2, %v1662_v50, 0 }
 0x2cf   : > { %4994 = vmatpush3.bf16.xpose.msra.mxu1 %v2376_v44  ;;  %v4810_v39 = vcombine.high %v597_v46, %v604_v13  ;;  %4995 = vmatprep.mubr.msk.bf16.mxu1 %vm5612_vm1, %v5609_v41  ;;  %v1467_v5 = vcombine.low %v1402_v8, %v1418_v9  ;;  %v1517_v23 = vcombine.low %v1466_v59, %v1498_v60  ;;  %p5519_p7 = pneg %p5518_p3 }
 0x2d0   : > { %v764_v51 = vrot.slane %v4804_v14, %v5927_v56  ;;  %v780_v10 = vrot.slane %v4806_v49, %v5927_v56  ;;  %4999 = vmatprep.subr.bf16.mxu1 %v5609_v41  ;;  %v796_v61 = vrot.slane %v4808_v11, %v5927_v56  ;;  %v1588_v24 = vcombine.high %v6030_v52, %v6033_v53 }
 0x2d1   : > { %v812_v63 = vrot.slane %v4810_v39, %v5927_v56  ;;  %v1499_v6 = vcombine.low %v1434_v57, %v1450_v58  ;;  %v1620_v33 = vcombine.high %v6036_v54, %v6039_v55  ;;  %v1475_v12 = vrot.slane %v1467_v5, %v5933_v62 }
 0x2d2   : > { %v829_v0 = vcombine.low %v764_v51, %v780_v10  ;;  %v830_v1 = vcombine.high %v764_v51, %v780_v10  ;;  %1703 = vrot.lane.b32.xlu1 %v5879_v31, %s5605_s8  ;;  %v1468_v15 = vcombine.high %v1402_v8, %v1418_v9  ;;  %v1500_v53 = vcombine.high %v1434_v57, %v1450_v58 }
 0x2d3   : > { %v861_v32 = vcombine.low %v796_v61, %v812_v63  ;;  %v862_v3 = vcombine.high %v796_v61, %v812_v63  ;;  %v1507_v52 = vrot.slane %v1499_v6, %v5933_v62  ;;  %v1014_v54 = vcombine.high %v6094_v47, %v6097_v48  ;;  %v1086_v61 = vpop.permute.xlu0 %1085 }
 0x2d4   : > { %v6159_v42 = vrot.slane %v829_v0, %v5933_v62  ;;  %v844_v16 = vrot.slane %v830_v1, %v5933_v62  ;;  %v1482_v17 = vrot.slane %v1468_v15, %v5933_v62  ;;  %v1514_v19 = vrot.slane %v1500_v53, %v5933_v62  ;;  %v1090_v0 = vpop.permute.xlu1 %1089 }
 0x2d5   : > { %v6166_v7 = vrot.slane %v861_v32, %v5933_v62  ;;  %v6182_v18 = vcombine.high %v1475_v12, %v1507_v52  ;;  %v876_v20 = vrot.slane %v862_v3, %v5933_v62  ;;  %v1663_v21 = vpack.c.bf16 %v1517_v23, %v1517_v23 }
 0x2d6   : > { %4996 = vmatmul.mubr.msk.bf16.vlgmr.msra.gmra.mrb[8].mxu1 %vm2279_vm2, %v1023_v2  ;;  %1709 = vrot.lane.b32.xlu1 %v5879_v31, %s5608_s13  ;;  %v1602_v28 = vrot.slane %v1588_v24, %v5933_v62  ;;  %v1634_v30 = vrot.slane %v1620_v33, %v5933_v62  ;;  %v6188_v47 = vcombine.low %v1482_v17, %v1514_v19 }
 0x2d7   : > { %5000 = vmatpush3.bf16.xpose.msra.mxu1 %v2422_v4  ;;  %5001 = vmatprep.mubr.msk.bf16.mxu1 %vm5612_vm1, %v5609_v41  ;;  %v6179_v55 = vcombine.high %v6159_v42, %v6166_v7  ;;  %v6190_v48 = vcombine.low %v844_v16, %v876_v20  ;;  %v1024_v36 = vpack.c.bf16 %v1014_v54, %v1014_v54  ;;  %v2468_v40 = vsel %vm2279_vm2, %v1663_v21, 0 }
 0x2d8   : > { %5005 = vmatprep.subr.bf16.mxu1 %v5609_v41  ;;  %v6192_v37 = vcombine.high %v1482_v17, %v1514_v19  ;;  %v6194_v38 = vcombine.high %v844_v16, %v876_v20  ;;  %v1653_v43 = vcombine.low %v1602_v28, %v1634_v30  ;;  %v950_v44 = vcombine.high %v6067_v22, %v6070_v25 }
 0x2d9   : > { %v982_v45 = vcombine.high %v6073_v26, %v6076_v27  ;;  %v1025_v13 = vpack.c.bf16 %v5967_v34, %v5967_v34  ;;  %v1518_v9 = vcombine.high %v1466_v59, %v1498_v60  ;;  %v1654_v27 = vcombine.high %v1602_v28, %v1634_v30 }
 0x2da   : > { %v1664_v46 = vpack.c.bf16 %v1653_v43, %v1653_v43  ;;  %v964_v14 = vrot.slane %v950_v44, %v5933_v62  ;;  %v1027_v51 = vpack.c.bf16 %v5969_v35, %v5969_v35  ;;  %v1519_v11 = vcombine.low %v1475_v12, %v1507_v52 }
 0x2db   : > { %v996_v49 = vrot.slane %v982_v45, %v5933_v62  ;;  %v1665_v25 = vpack.c.bf16 %v1518_v9, %v1518_v9  ;;  %v1666_v50 = vpack.c.bf16 %v1654_v27, %v1654_v27  ;;  %v881_v35 = vcombine.low %v6159_v42, %v6166_v7 }
 0x2dc   : > { %v2514_v8 = vsel %vm2279_vm2, %v1664_v46, 0  ;;  %v1667_v57 = vpack.c.bf16 %v1519_v11, %v1519_v11 }
 0x2dd   : > { %v1015_v22 = vcombine.low %v964_v14, %v996_v49  ;;  %v2560_v34 = vsel %vm2279_vm2, %v1665_v25, 0  ;;  %v2606_v10 = vsel %vm2279_vm2, %v1666_v50, 0  ;;  %v1016_v39 = vcombine.high %v964_v14, %v996_v49 }
 0x2de   : > { %5002 = vmatmul.mubr.msk.bf16.vlgmr.msra.gmra.mrb[12].mxu1 %vm2279_vm2, %v1024_v36  ;;  %v2652_v59 = vsel %vm2279_vm2, %v1667_v57, 0  ;;  %v1029_v60 = vpack.c.bf16 %v881_v35, %v881_v35 }
 0x2df   : > { %5006 = vmatpush3.bf16.xpose.msra.mxu1 %v2468_v40  ;;  %5007 = vmatprep.mubr.msk.bf16.mxu1 %vm5612_vm1, %v5609_v41  ;;  %v1026_v26 = vpack.c.bf16 %v1015_v22, %v1015_v22  ;;  %v1028_v58 = vpack.c.bf16 %v1016_v39, %v1016_v39 }
 0x2e0   : > { %5011 = vmatprep.subr.bf16.mxu1 %v5609_v41 }
 0x2e6   : > { %5008 = vmatmul.mubr.msk.bf16.vlgmr.msra.gmra.mrb[16].mxu1 %vm2279_vm2, %v1025_v13 }
 0x2e7   : > { %5012 = vmatpush3.bf16.xpose.msra.mxu1 %v2514_v8  ;;  %5013 = vmatprep.mubr.msk.bf16.mxu1 %vm5612_vm1, %v5609_v41 }
 0x2e8   : > { %5017 = vmatprep.subr.bf16.mxu1 %v5609_v41 }
 0x2ee   : > { %5014 = vmatmul.mubr.msk.bf16.vlgmr.msra.gmra.mrb[20].mxu1 %vm2279_vm2, %v1026_v26 }
 0x2ef   : > { %5018 = vmatpush3.bf16.xpose.msra.mxu1 %v2560_v34  ;;  %5019 = vmatprep.mubr.msk.bf16.mxu1 %vm5612_vm1, %v5609_v41 }
 0x2f0   : > { %5023 = vmatprep.subr.bf16.mxu1 %v5609_v41 }
 0x2f6   : > { %5020 = vmatmul.mubr.msk.bf16.vlgmr.msra.gmra.mrb[24].mxu1 %vm2279_vm2, %v1027_v51 }
 0x2f7   : > { %5024 = vmatpush3.bf16.xpose.msra.mxu1 %v2606_v10  ;;  %5025 = vmatprep.mubr.msk.bf16.mxu1 %vm5612_vm1, %v5609_v41 }
 0x2f8   : > { %5029 = vmatprep.subr.bf16.mxu1 %v5609_v41 }
 0x2fe   : > { %5026 = vmatmul.mubr.msk.bf16.vlgmr.msra.gmra.mrb[28].mxu1 %vm2279_vm2, %v1028_v58 }
 0x2ff   : > { %5030 = vmatpush3.bf16.xpose.msra.mxu1 %v2652_v59  ;;  %5031 = vmatprep.mubr.msk.bf16.mxu1 %vm5612_vm1, %v5609_v41 }
 0x300   : > { %5035 = vmatprep.subr.bf16.mxu1 %v5609_v41 }
 0x306   : > { %5032 = vmatmul.mubr.msk.bf16.vlgmr.msra.gmra.mrb[32].mxu1 %vm2279_vm2, %v1029_v60 }
 0x307   : > { %5037 = vmatprep.mubr.msk.bf16.mxu1 %vm5612_vm1, %v5609_v41 }
 0x31b   : > { %v1094_v63 = vpop.permute.xlu0 %1093 }
 0x31c   : > { %v1283_v2 = vcombine.low %v1086_v61, %v1094_v63  ;;  %v1284_v32 = vcombine.high %v1086_v61, %v1094_v63 }
 0x31e   : > { %v1291_v24 = vrot.slane %v1283_v2, %v5927_v56  ;;  %v1298_v6 = vrot.slane %v1284_v32, %v5927_v56 }
 0x31f   : > { %v456_v1 = vpop.permute.xlu0 %455 }
 0x323   : > { %v468_v3 = vpop.permute.xlu0 %467  ;;  %v1098_v4 = vpop.permute.xlu1 %1097 }
 0x324   : > { %v1299_v5 = vcombine.low %v1090_v0, %v1098_v4  ;;  %v1300_v23 = vcombine.high %v1090_v0, %v1098_v4  ;;  %v645_v21 = vcombine.low %v456_v1, %v468_v3  ;;  %v646_v28 = vcombine.high %v456_v1, %v468_v3 }
 0x326   : > { %v1307_v42 = vrot.slane %v1299_v5, %v5927_v56  ;;  %v1314_v33 = vrot.slane %v1300_v23, %v5927_v56  ;;  %v653_v26 = vrot.slane %v645_v21, %v5927_v56  ;;  %v660_v34 = vrot.slane %v646_v28, %v5927_v56 }
 0x327   : > { %v1678_v12 = vpop.permute.xlu0 %1677 }
 0x328   : > { %v1347_v7 = vcombine.low %v1291_v24, %v1307_v42  ;;  %v1348_v15 = vcombine.high %v1291_v24, %v1307_v42  ;;  %v1363_v52 = vcombine.low %v1298_v6, %v1314_v33  ;;  %v1364_v53 = vcombine.high %v1298_v6, %v1314_v33  ;;  %v462_v16 = vpop.permute.xlu1 %461 }
 0x32a   : > { %v1355_v54 = vrot.slane %v1347_v7, %v5933_v62  ;;  %v1362_v17 = vrot.slane %v1348_v15, %v5933_v62  ;;  %v1371_v19 = vrot.slane %v1363_v52, %v5933_v62  ;;  %v1378_v20 = vrot.slane %v1364_v53, %v5933_v62 }
 0x32b   : > { %v1684_v30 = vpop.permute.xlu0 %1683 }
 0x32c   : > { %v4828_v36 = vcombine.low %v1355_v54, %v1362_v17  ;;  %v4830_v40 = vcombine.high %v1355_v54, %v1362_v17  ;;  %v4832_v43 = vcombine.low %v1371_v19, %v1378_v20  ;;  %v4834_v44 = vcombine.high %v1371_v19, %v1378_v20  ;;  %v474_v45 = vpop.permute.xlu1 %473 }
 0x32d   : > { %v1719_v46 = vcombine.low %v5877_v29, %v1684_v30  ;;  %v1720_v13 = vcombine.high %v5877_v29, %v1684_v30  ;;  %v661_v14 = vcombine.low %v462_v16, %v474_v45  ;;  %v662_v49 = vcombine.high %v462_v16, %v474_v45 }
 0x32e   : > { %v6247_v8 = vrot.slane %v4828_v36, %v5927_v56  ;;  %v6250_v9 = vrot.slane %v4830_v40, %v5927_v56  ;;  %v6253_v22 = vrot.slane %v4832_v43, %v5927_v56  ;;  %v6256_v25 = vrot.slane %v4834_v44, %v5927_v56 }
 0x32f   : > { %v669_v27 = vrot.slane %v661_v14, %v5927_v56  ;;  %v676_v50 = vrot.slane %v662_v49, %v5927_v56  ;;  %v1690_v51 = vpop.permute.xlu0 %1689  ;;  %v1727_v10 = vrot.slane %v1719_v46, %v5927_v56  ;;  %v1734_v11 = vrot.slane %v1720_v13, %v5927_v56 }
 0x330   : > { %v1735_v39 = vcombine.low %v1678_v12, %v1690_v51  ;;  %v1736_v57 = vcombine.high %v1678_v12, %v1690_v51  ;;  %v1680_v58 = vpop.permute.xlu1 %1679  ;;  %v1603_v1 = vcombine.low %v6247_v8, %v6250_v9  ;;  %v1635_v2 = vcombine.low %v6253_v22, %v6256_v25 }
 0x331   : > { %v709_v59 = vcombine.low %v653_v26, %v669_v27  ;;  %v710_v35 = vcombine.high %v653_v26, %v669_v27  ;;  %v725_v60 = vcombine.low %v660_v34, %v676_v50  ;;  %v726_v61 = vcombine.high %v660_v34, %v676_v50 }
 0x332   : > { %v1743_v63 = vrot.slane %v1735_v39, %v5927_v56  ;;  %v1750_v0 = vrot.slane %v1736_v57, %v5927_v56  ;;  %v1611_v40 = vrot.slane %v1603_v1, %v5933_v62  ;;  %v1643_v43 = vrot.slane %v1635_v2, %v5933_v62 }
 0x333   : > { %v717_v32 = vrot.slane %v709_v59, %v5933_v62  ;;  %v724_v3 = vrot.slane %v710_v35, %v5933_v62  ;;  %v733_v4 = vrot.slane %v725_v60, %v5933_v62  ;;  %v740_v5 = vrot.slane %v726_v61, %v5933_v62 }
 0x334   : > { %v1783_v23 = vcombine.low %v1727_v10, %v1743_v63  ;;  %v1784_v24 = vcombine.high %v1727_v10, %v1743_v63  ;;  %v1799_v6 = vcombine.low %v1734_v11, %v1750_v0  ;;  %v1800_v42 = vcombine.high %v1734_v11, %v1750_v0  ;;  %v1686_v33 = vpop.permute.xlu1 %1685 }
 0x335   : > { %v4812_v12 = vcombine.low %v717_v32, %v724_v3  ;;  %v4814_v7 = vcombine.high %v717_v32, %v724_v3  ;;  %v4816_v15 = vcombine.low %v733_v4, %v740_v5  ;;  %v4818_v52 = vcombine.high %v733_v4, %v740_v5 }
 0x336   : > { %v1791_v53 = vrot.slane %v1783_v23, %v5933_v62  ;;  %v1798_v16 = vrot.slane %v1784_v24, %v5933_v62  ;;  %v1807_v54 = vrot.slane %v1799_v6, %v5933_v62  ;;  %v1814_v17 = vrot.slane %v1800_v42, %v5933_v62 }
 0x337   : > { %v6279_v19 = vrot.slane %v4812_v12, %v5927_v56  ;;  %v6282_v20 = vrot.slane %v4814_v7, %v5927_v56  ;;  %v6285_v21 = vrot.slane %v4816_v15, %v5927_v56  ;;  %v6288_v28 = vrot.slane %v4818_v52, %v5927_v56 }
 0x338   : > { %v4835_v30 = vcombine.low %v1791_v53, %v1798_v16  ;;  %v4837_v36 = vcombine.high %v1791_v53, %v1798_v16  ;;  %v1692_v46 = vpop.permute.xlu1 %1691  ;;  %v4839_v49 = vcombine.low %v1807_v54, %v1814_v17  ;;  %v4841_v26 = vcombine.high %v1807_v54, %v1814_v17 }
 0x339   : > { %v965_v44 = vcombine.low %v6279_v19, %v6282_v20  ;;  %v997_v45 = vcombine.low %v6285_v21, %v6288_v28  ;;  %v1855_v34 = vcombine.low %v5879_v31, %v1686_v33  ;;  %v1856_v27 = vcombine.high %v5879_v31, %v1686_v33 }
 0x33a   : > { %v6297_v13 = vrot.slane %v4835_v30, %v5927_v56  ;;  %v6300_v14 = vrot.slane %v4837_v36, %v5927_v56  ;;  %v1871_v50 = vcombine.low %v1680_v58, %v1692_v46  ;;  %v1872_v51 = vcombine.high %v1680_v58, %v1692_v46 }
 0x33b   : > { %v1655_v10 = vcombine.low %v1611_v40, %v1643_v43  ;;  %v6305_v11 = vrot.slane %v965_v44, %v5933_v62  ;;  %v6308_v39 = vrot.slane %v997_v45, %v5933_v62  ;;  %v1863_v57 = vrot.slane %v1855_v34, %v5927_v56 }
 0x33c   : > { %v1870_v59 = vrot.slane %v1856_v27, %v5927_v56  ;;  %v1879_v35 = vrot.slane %v1871_v50, %v5927_v56  ;;  %v1886_v60 = vrot.slane %v1872_v51, %v5927_v56  ;;  %v6314_v61 = vpop.permute.xlu1 %1695  ;;  %v6317_v63 = vrot.slane %v4839_v49, %v5927_v56 }
 0x33d   : > { %v6320_v58 = vrot.slane %v4841_v26, %v5927_v56  ;;  %v1668_v0 = vpack.c.bf16 %v1655_v10, %v1655_v10  ;;  %v2055_v1 = vcombine.low %v6297_v13, %v6300_v14  ;;  %v1017_v23 = vcombine.low %v6305_v11, %v6308_v39 }
 0x33e   : > { %v1919_v2 = vcombine.low %v1863_v57, %v1879_v35  ;;  %v1920_v32 = vcombine.high %v1863_v57, %v1879_v35  ;;  %v1935_v3 = vcombine.low %v1870_v59, %v1886_v60  ;;  %v1936_v4 = vcombine.high %v1870_v59, %v1886_v60  ;;  %v6357_v60 = vpop.permute.xlu0 %1697 }
 0x33f   : > { %v2698_v5 = vsel %vm2279_vm2, %v1668_v0, 0  ;;  %v1669_v7 = vpack.c.bf16 %v6182_v18, %v6182_v18  ;;  %v2063_v15 = vrot.slane %v2055_v1, %v5933_v62  ;;  %v2087_v52 = vcombine.low %v6317_v63, %v6320_v58 }
 0x340   : > { %v1927_v24 = vrot.slane %v1919_v2, %v5933_v62  ;;  %v1934_v6 = vrot.slane %v1920_v32, %v5933_v62  ;;  %v1943_v42 = vrot.slane %v1935_v3, %v5933_v62  ;;  %v1950_v33 = vrot.slane %v1936_v4, %v5933_v62  ;;  %5036 = vmatpush3.bf16.xpose.msra.mxu1 %v2698_v5  ;;  %v6331_v12 = vpop.permute.xlu1 %1701 }
 0x341   : > { %5041 = vmatprep.subr.bf16.mxu1 %v5609_v41  ;;  %v1030_v30 = vpack.c.bf16 %v1017_v23, %v1017_v23  ;;  %v2095_v36 = vrot.slane %v2087_v52, %v5933_v62  ;;  %v2744_v34 = vsel %vm2279_vm2, %v1669_v7, 0  ;;  %v1656_v10 = vcombine.high %v1611_v40, %v1643_v43 }
 0x342   : > { %v4843_v53 = vcombine.low %v1927_v24, %v1934_v6  ;;  %v4845_v16 = vcombine.high %v1927_v24, %v1934_v6  ;;  %v4847_v54 = vcombine.low %v1943_v42, %v1950_v33  ;;  %v4849_v17 = vcombine.high %v1943_v42, %v1950_v33 }
 0x343   : > { %v2119_v26 = vcombine.low %v2063_v15, %v2095_v36  ;;  %v6348_v57 = vcombine.high %v2063_v15, %v2095_v36  ;;  %v2056_v59 = vcombine.high %v6297_v13, %v6300_v14  ;;  %v1670_v14 = vpack.c.bf16 %v1656_v10, %v1656_v10 }
 0x344   : > { %v2135_v44 = vrot.slane %v4843_v53, %v5927_v56  ;;  %v2151_v45 = vrot.slane %v4845_v16, %v5927_v56  ;;  %v2167_v46 = vrot.slane %v4847_v54, %v5927_v56  ;;  %v2183_v18 = vrot.slane %v4849_v17, %v5927_v56  ;;  %v6344_v49 = vpop.permute.xlu1 %1703 }
 0x345   : > { %v2263_v51 = vpack.c.bf16 %v2119_v26, %v2119_v26  ;;  %v1031_v32 = vpack.c.bf16 %v6179_v55, %v6179_v55  ;;  %v2070_v3 = vrot.slane %v2056_v59, %v5933_v62  ;;  %v2088_v4 = vcombine.high %v6317_v63, %v6320_v58 }
 0x346   : > { %v2191_v27 = vcombine.low %v2135_v44, %v2151_v45  ;;  %v2223_v50 = vcombine.low %v2167_v46, %v2183_v18  ;;  %v2192_v5 = vcombine.high %v2135_v44, %v2151_v45  ;;  %v2224_v23 = vcombine.high %v2167_v46, %v2183_v18 }
 0x347   : > { %5038 = vmatmul.mubr.msk.bf16.vlgmr.msra.gmra.mrb[36].mxu1 %vm2279_vm2, %v1030_v30  ;;  %v3181_v0 = vsel %vm3179_vm3, %v2263_v51, 0  ;;  %v2790_v24 = vsel %vm2279_vm2, %v1670_v14, 0  ;;  %v1604_v6 = vcombine.high %v6247_v8, %v6250_v9  ;;  %v1636_v42 = vcombine.high %v6253_v22, %v6256_v25 }
 0x348   : > { %5042 = vmatpush3.bf16.xpose.msra.mxu1 %v2744_v34  ;;  %5043 = vmatprep.mubr.msk.bf16.mxu1 %vm5612_vm1, %v5609_v41  ;;  %v6355_v35 = vrot.slane %v2191_v27, %v5933_v62  ;;  %v6360_v1 = vpop.permute.xlu1 %1709  ;;  %v2231_v40 = vrot.slane %v2223_v50, %v5933_v62  ;;  %v2102_v55 = vrot.slane %v2088_v4, %v5933_v62 }
 0x349   : > { %5047 = vmatprep.subr.bf16.mxu1 %v5609_v41  ;;  %5078 = vmatpush3.bf16.msra.mxu0 %v3181_v0  ;;  %v1887_v43 = vcombine.low %v6357_v60, %v6360_v1  ;;  %v1888_v13 = vcombine.high %v6357_v60, %v6360_v1  ;;  %v2206_v63 = vrot.slane %v2192_v5, %v5933_v62 }
 0x34a   : > { %5089 = vmatprep.subr.bf16.mxu0 %v5609_v41  ;;  %v6370_v2 = vcombine.high %v6355_v35, %v2231_v40  ;;  %v2238_v58 = vrot.slane %v2224_v23, %v5933_v62  ;;  %v1018_v33 = vcombine.high %v6305_v11, %v6308_v39  ;;  %v6391_v7 = vcombine.low %v2070_v3, %v2102_v55 }
 0x34b   : > { %v6395_v9 = vcombine.high %v2070_v3, %v2102_v55  ;;  %v1671_v25 = vpack.c.bf16 %v6188_v47, %v6188_v47  ;;  %v1618_v15 = vrot.slane %v1604_v6, %v5933_v62  ;;  %v1650_v52 = vrot.slane %v1636_v42, %v5933_v62 }
 0x34c   : > { %v6393_v8 = vcombine.low %v2206_v63, %v2238_v58  ;;  %v6397_v22 = vcombine.high %v2206_v63, %v2238_v58  ;;  %v1032_v53 = vpack.c.bf16 %v1018_v33, %v1018_v33  ;;  %v966_v16 = vcombine.high %v6279_v19, %v6282_v20 }
 0x34d   : > { %v2836_v11 = vsel %vm2279_vm2, %v1671_v25, 0  ;;  %v1657_v39 = vcombine.low %v1618_v15, %v1650_v52  ;;  %v998_v47 = vcombine.high %v6285_v21, %v6288_v28  ;;  %v1033_v17 = vpack.c.bf16 %v6190_v48, %v6190_v48 }
 0x34e   : > { %v980_v30 = vrot.slane %v966_v16, %v5933_v62  ;;  %v1673_v20 = vpack.c.bf16 %v6192_v37, %v6192_v37  ;;  %v1658_v28 = vcombine.high %v1618_v15, %v1650_v52  ;;  %v1035_v46 = vpack.c.bf16 %v6194_v38, %v6194_v38 }
 0x34f   : > { %5044 = vmatmul.mubr.msk.bf16.vlgmr.msra.gmra.mrb[40].mxu1 %vm2279_vm2, %v1031_v32  ;;  %v1672_v54 = vpack.c.bf16 %v1657_v39, %v1657_v39  ;;  %v1012_v36 = vrot.slane %v998_v47, %v5933_v62  ;;  %v2255_v18 = vcombine.low %v6355_v35, %v2231_v40 }
 0x350   : > { %5048 = vmatpush3.bf16.xpose.msra.mxu1 %v2790_v24  ;;  %5049 = vmatprep.mubr.msk.bf16.mxu1 %vm5612_vm1, %v5609_v41  ;;  %v2928_v48 = vsel %vm2279_vm2, %v1673_v20, 0  ;;  %v1674_v45 = vpack.c.bf16 %v1658_v28, %v1658_v28 }
 0x351   : > { %5053 = vmatprep.subr.bf16.mxu1 %v5609_v41  ;;  %v2882_v44 = vsel %vm2279_vm2, %v1672_v54, 0  ;;  %v1019_v19 = vcombine.low %v980_v30, %v1012_v36  ;;  %v1020_v26 = vcombine.high %v980_v30, %v1012_v36  ;;  %v2264_v34 = vpack.c.bf16 %v2255_v18, %v2255_v18 }
 0x352   : > { %v2974_v37 = vsel %vm2279_vm2, %v1674_v45, 0 }
 0x353   : > { %v1034_v21 = vpack.c.bf16 %v1019_v19, %v1019_v19  ;;  %v1036_v27 = vpack.c.bf16 %v1020_v26, %v1020_v26  ;;  %v3227_v50 = vsel %vm3179_vm3, %v2264_v34, 0 }
 0x357   : > { %5050 = vmatmul.mubr.msk.bf16.vlgmr.msra.gmra.mrb[44].mxu1 %vm2279_vm2, %v1032_v53 }
 0x358   : > { %5054 = vmatpush3.bf16.xpose.msra.mxu1 %v2836_v11  ;;  %5055 = vmatprep.mubr.msk.bf16.mxu1 %vm5612_vm1, %v5609_v41 }
 0x359   : > { %5059 = vmatprep.subr.bf16.mxu1 %v5609_v41 }
 0x35f   : > { %5056 = vmatmul.mubr.msk.bf16.vlgmr.msra.gmra.mrb[48].mxu1 %vm2279_vm2, %v1033_v17 }
 0x360   : > { %5060 = vmatpush3.bf16.xpose.msra.mxu1 %v2882_v44  ;;  %5061 = vmatprep.mubr.msk.bf16.mxu1 %vm5612_vm1, %v5609_v41 }
 0x361   : > { %5065 = vmatprep.subr.bf16.mxu1 %v5609_v41 }
 0x367   : > { %5062 = vmatmul.mubr.msk.bf16.vlgmr.msra.gmra.mrb[52].mxu1 %vm2279_vm2, %v1034_v21 }
 0x368   : > { %5066 = vmatpush3.bf16.xpose.msra.mxu1 %v2928_v48  ;;  %5067 = vmatprep.mubr.msk.bf16.mxu1 %vm5612_vm1, %v5609_v41 }
 0x369   : > { %5071 = vmatprep.subr.bf16.mxu1 %v5609_v41 }
 0x36f   : > { %5068 = vmatmul.mubr.msk.bf16.vlgmr.msra.gmra.mrb[56].mxu1 %vm2279_vm2, %v1035_v46 }
 0x370   : > { %5072 = vmatpush3.bf16.xpose.msra.mxu1 %v2974_v37  ;;  %5073 = vmatprep.mubr.msk.bf16.mxu1 %vm5612_vm1, %v5609_v41 }
 0x371   : > { %5083 = vmatprep.subr.bf16.mxu1 %v5609_v41 }
 0x377   : > { %5074 = vmatmul.mubr.msk.bf16.vlgmr.msra.gmra.mrb[60].mxu1 %vm2279_vm2, %v1036_v27 }
 0x378   : > { %5084 = vmatpush3.bf16.msra.mxu1 %v3227_v50  ;;  %5085 = vmatprep.mubr.msk.bf16.mxu1 %vm5612_vm1, %v5609_v41 }
 0x379   : > { %5095 = vmatprep.subr.bf16.mxu1 %v5609_v41 }
 0x399   : > { %v6441_v38 = vpop.f32.mrb[0].mxu1 }
 0x39a   : > { %v4985_v51 = vpop.f32.mrb[1].mxu1  ;;  %v3016_v10 = vsel %vm2279_vm2, %v6441_v38, -inf }
 0x39b   : > { %v2323_v59 = vpop.f32.mrb[2].mxu1  ;;  %3017 = vmax.xlane.f32.xlu0 %v3016_v10 }
 0x39c   : > { %v4986_v35 = vpop.f32.mrb[3].mxu1 }
 0x3a1   : > { %v6445_v0 = vpop.f32.mrb[4].mxu1 }
 0x3a2   : > { %v4991_v40 = vpop.f32.mrb[5].mxu1  ;;  %v3019_v14 = vsel %vm2279_vm2, %v6445_v0, -inf }
 0x3a3   : > { %v2369_v32 = vpop.f32.mrb[6].mxu1  ;;  %3020 = vmax.xlane.f32.xlu1 %v3019_v14  ;;  %v6485_v14 = vpop.permute.xlu0 %1707 }
 0x3a4   : > { %v4992_v3 = vpop.f32.mrb[7].mxu1 }
 0x3a9   : > { %v6449_v4 = vpop.f32.mrb[8].mxu1 }
 0x3aa   : > { %v4997_v5 = vpop.f32.mrb[9].mxu1  ;;  %v3022_v23 = vsel %vm2279_vm2, %v6449_v4, -inf }
 0x3ab   : > { %v2415_v24 = vpop.f32.mrb[10].mxu1  ;;  %3023 = vmax.xlane.f32.xlu0 %v3022_v23 }
 0x3ac   : > { %v4998_v6 = vpop.f32.mrb[11].mxu1 }
 0x3b1   : > { %v6453_v42 = vpop.f32.mrb[12].mxu1 }
 0x3b2   : > { %v5003_v55 = vpop.f32.mrb[13].mxu1  ;;  %v3025_v63 = vsel %vm2279_vm2, %v6453_v42, -inf }
 0x3b3   : > { %v2461_v58 = vpop.f32.mrb[14].mxu1  ;;  %3026 = vmax.xlane.f32.xlu1 %v3025_v63 }
 0x3b4   : > { %v5004_v33 = vpop.f32.mrb[15].mxu1 }
 0x3b9   : > { %v6457_v25 = vpop.f32.mrb[16].mxu1 }
 0x3ba   : > { %v5009_v15 = vpop.f32.mrb[17].mxu1  ;;  %v3028_v52 = vsel %vm2279_vm2, %v6457_v25, -inf }
 0x3bb   : > { %v2507_v53 = vpop.f32.mrb[18].mxu1  ;;  %3029 = vmax.xlane.f32.xlu0 %v3028_v52 }
 0x3bc   : > { %v5010_v11 = vpop.f32.mrb[19].mxu1 }
 0x3c1   : > { %v6461_v39 = vpop.f32.mrb[20].mxu1 }
 0x3c2   : > { %v5015_v16 = vpop.f32.mrb[21].mxu1  ;;  %v3031_v47 = vsel %vm2279_vm2, %v6461_v39, -inf }
 0x3c3   : > { %v2553_v54 = vpop.f32.mrb[22].mxu1  ;;  %3032 = vmax.xlane.f32.xlu0 %v3031_v47 }
 0x3c4   : > { %v5016_v17 = vpop.f32.mrb[23].mxu1  ;;  %v2265_v54 = vpack.c.bf16 %v6348_v57, %v6348_v57 }
 0x3c9   : > { %v6465_v30 = vpop.f32.mrb[24].mxu1 }
 0x3ca   : > { %v5021_v36 = vpop.f32.mrb[25].mxu1  ;;  %v3034_v44 = vsel %vm2279_vm2, %v6465_v30, -inf }
 0x3cb   : > { %v2599_v19 = vpop.f32.mrb[26].mxu1  ;;  %3035 = vmax.xlane.f32.xlu1 %v3034_v44 }
 0x3cc   : > { %v5022_v20 = vpop.f32.mrb[27].mxu1 }
 0x3d1   : > { %v6469_v21 = vpop.f32.mrb[28].mxu1 }
 0x3d2   : > { %v5027_v48 = vpop.f32.mrb[29].mxu1  ;;  %v3037_v28 = vsel %vm2279_vm2, %v6469_v21, -inf }
 0x3d3   : > { %v2645_v45 = vpop.f32.mrb[30].mxu1  ;;  %3038 = vmax.xlane.f32.xlu0 %v3037_v28 }
 0x3d4   : > { %v5028_v46 = vpop.f32.mrb[31].mxu1 }
 0x3d9   : > { %v6473_v37 = vpop.f32.mrb[32].mxu1 }
 0x3da   : > { %v5033_v18 = vpop.f32.mrb[33].mxu1  ;;  %v3040_v26 = vsel %vm2279_vm2, %v6473_v37, -inf }
 0x3db   : > { %v2691_v34 = vpop.f32.mrb[34].mxu1  ;;  %3041 = vmax.xlane.f32.xlu1 %v3040_v26 }
 0x3dc   : > { %v5034_v27 = vpop.f32.mrb[35].mxu1 }
 0x3ec   : > { %1715 = vrot.lane.b32.xlu1 %v5879_v31, %s5607_s24 }
 0x41a   : > { %v6479_v50 = vpop.f32.mrb[36].mxu1 }
 0x41b   : > { %v5039_v51 = vpop.f32.mrb[37].mxu1  ;;  %v3043_v10 = vsel %vm2279_vm2, %v6479_v50, -inf }
 0x41c   : > { %v2737_v59 = vpop.f32.mrb[38].mxu1  ;;  %3044 = vmax.xlane.f32.xlu0 %v3043_v10 }
 0x41d   : > { %v5040_v35 = vpop.f32.mrb[39].mxu1 }
 0x41e   : > { %v2267_v35 = vpack.c.bf16 %v6391_v7, %v6391_v7 }
 0x422   : > { %v6483_v40 = vpop.f32.mrb[40].mxu1 }
 0x423   : > { %v5045_v32 = vpop.f32.mrb[41].mxu1 }
 0x424   : > { %v2783_v3 = vpop.f32.mrb[42].mxu1 }
 0x425   : > { %v5046_v5 = vpop.f32.mrb[43].mxu1 }
 0x428   : > { %v3018_v23 = vpop.xlane.xlu0 %3017 }
 0x429   : > { %v3064_v24 = vsub.f32 %v6441_v38, %v3018_v23 }
 0x42a   : > { %v6488_v31 = vpop.f32.mrb[44].mxu1 }
 0x42b   : > { %v3080_v6 = vmul.f32 1.442695, %v3064_v24  ;;  %v5051_v55 = vpop.f32.mrb[45].mxu1  ;;  %v3049_v63 = vsel %vm2279_vm2, %v6488_v31, -inf }
 0x42c   : > { %v2829_v58 = vpop.f32.mrb[46].mxu1  ;;  %3050 = vmax.xlane.f32.xlu1 %v3049_v63  ;;  %v3365_v63 = vsel %vm3179_vm3, %v2267_v35, 0 }
 0x42d   : > { %5338 = vpow2.f32 %v3080_v6  ;;  %v5052_v33 = vpop.f32.mrb[47].mxu1 }
 0x430   : > { %v3021_v15 = vpop.xlane.xlu1 %3020 }
 0x431   : > { %v3065_v52 = vsub.f32 %v6445_v0, %v3021_v15  ;;  %v3273_v0 = vsel %vm3179_vm3, %v2265_v54, 0  ;;  %v2268_v15 = vpack.c.bf16 %v6393_v8, %v6393_v8 }
 0x432   : > { %v6493_v53 = vpop.f32.mrb[48].mxu1  ;;  %1713 = vrot.lane.b32.xlu0 %v5877_v29, %s5607_s24  ;;  %s5620_s24 = smov [#allocation10]  }
 0x433   : > { %v3082_v38 = vmul.f32 1.442695, %v3065_v52  ;;  %v5057_v11 = vpop.f32.mrb[49].mxu1  ;;  %v3411_v54 = vsel %vm3179_vm3, %v2268_v15, 0  ;;  %v3052_v8 = vsel %vm2279_vm2, %v6493_v53, -inf  ;;  %s5520_s13 = sshll.u32 %s5620_s24, 4  ;;  %s5521_s13 = int_to_ptr.vmem [resolvable:$false] %s5520_s13 }
 0x434   : > { %v2875_v16 = vpop.f32.mrb[50].mxu1  ;;  %p5523_p12 = scmp.lt.s32.totalorder %s6792_s23, %s5521_s13 }
 0x435   : > { %5340 = vpow2.f32 %v3082_v38  ;;  %v5058_v47 = vpop.f32.mrb[51].mxu1  ;;  %v3046_v38 = vsel %vm2279_vm2, %v6483_v40, -inf }
 0x437   : > { %v5339_v17 = vpop.eup %5338 }
 0x438   : > { %v3160_v36 = vpack.c.bf16 %v5339_v17, %v5339_v17  ;;  %v3024_v44 = vpop.xlane.xlu0 %3023  ;;  %v3112_v3 = vsel %vm2279_vm2, %v5339_v17, 0.0 }
 0x439   : > { %v3066_v19 = vsub.f32 %v6449_v4, %v3024_v44  ;;  %v2266_v4 = vpack.c.bf16 %v6370_v2, %v6370_v2 }
 0x43a   : > { %5080 = vmatmul.mubr.msk.bf16.vlgmr.msra.gmra.mrb[4].mxu0 %vm2279_vm2, %v3160_v36  ;;  %v6502_v20 = vpop.f32.mrb[52].mxu1  ;;  %v2269_v36 = vpack.c.bf16 %v6395_v9, %v6395_v9 }
 0x43b   : > { %5090 = vmatpush3.bf16.msra.mxu0 %v3273_v0  ;;  %5091 = vmatprep.mubr.msk.bf16.mxu0 %vm5612_vm1, %v5609_v41  ;;  %v3084_v29 = vmul.f32 1.442695, %v3066_v19  ;;  %v5063_v48 = vpop.f32.mrb[53].mxu1  ;;  %v3319_v27 = vsel %vm3179_vm3, %v2266_v4, 0  ;;  %v3055_v44 = vsel %vm2279_vm2, %v6502_v20, -inf }
 0x43c   : > { %5101 = vmatprep.subr.bf16.mxu0 %v5609_v41  ;;  %v2921_v57 = vpop.f32.mrb[54].mxu1 }
 0x43d   : > { %5342 = vpow2.f32 %v3084_v29  ;;  %v5064_v28 = vpop.f32.mrb[55].mxu1  ;;  %v3457_v57 = vsel %vm3179_vm3, %v2269_v36, 0 }
 0x43f   : > { %v6509_v45 = vpop.eup %5340 }
 0x440   : > { %v3027_v46 = vpop.xlane.xlu1 %3026  ;;  %v3161_v18 = vpack.c.bf16 %v6509_v45, %v6509_v45 }
 0x441   : > { %v3067_v26 = vsub.f32 %v6453_v42, %v3027_v46  ;;  %v3115_v46 = vsel %vm2279_vm2, %v6509_v45, 0.0 }
 0x442   : > { %v6514_v34 = vpop.f32.mrb[56].mxu1  ;;  %5086 = vmatmul.mubr.msk.bf16.vlgmr.msra.gmra.mrb[64].mxu1 %vm2279_vm2, %v3161_v18 }
 0x443   : > { %v3086_v51 = vmul.f32 1.442695, %v3067_v26  ;;  %v5069_v10 = vpop.f32.mrb[57].mxu1  ;;  %v3058_v59 = vsel %vm2279_vm2, %v6514_v34, -inf  ;;  %5096 = vmatpush3.bf16.msra.mxu1 %v3319_v27  ;;  %5097 = vmatprep.mubr.msk.bf16.mxu1 %vm5612_vm1, %v5609_v41 }
 0x444   : > { %v2967_v2 = vpop.f32.mrb[58].mxu1  ;;  %3059 = vmax.xlane.f32.xlu1 %v3058_v59  ;;  %5107 = vmatprep.subr.bf16.mxu1 %v5609_v41 }
 0x445   : > { %5344 = vpow2.f32 %v3086_v51  ;;  %v5070_v42 = vpop.f32.mrb[59].mxu1 }
 0x447   : > { %v5343_v32 = vpop.eup %5342 }
 0x448   : > { %3113 = vadd.xlane.f32.xlu1 %v3112_v3  ;;  %v3030_v5 = vpop.xlane.xlu0 %3029  ;;  %v3162_v23 = vpack.c.bf16 %v5343_v32, %v5343_v32  ;;  %v3118_v6 = vsel %vm2279_vm2, %v5343_v32, 0.0 }
 0x449   : > { %v3068_v24 = vsub.f32 %v6457_v25, %v3030_v5 }
 0x44a   : > { %v6528_v55 = vpop.f32.mrb[60].mxu1  ;;  %5092 = vmatmul.mubr.msk.bf16.vlgmr.msra.gmra.mrb[8].mxu0 %vm2279_vm2, %v3162_v23 }
 0x44b   : > { %v3088_v58 = vmul.f32 1.442695, %v3068_v24  ;;  %v5075_v33 = vpop.f32.mrb[61].mxu1  ;;  %5102 = vmatpush3.bf16.msra.mxu0 %v3365_v63  ;;  %5103 = vmatprep.mubr.msk.bf16.mxu0 %vm5612_vm1, %v5609_v41  ;;  %v3061_v9 = vsel %vm2279_vm2, %v6528_v55, -inf }
 0x44c   : > { %v3013_v7 = vpop.f32.mrb[62].mxu1  ;;  %3119 = vadd.xlane.f32.xlu1 %v3118_v6  ;;  %5113 = vmatprep.subr.bf16.mxu0 %v5609_v41  ;;  %v1895_v6 = vrot.slane %v1887_v43, %v5927_v56 }
 0x44d   : > { %5346 = vpow2.f32 %v3088_v58  ;;  %v5076_v25 = vpop.f32.mrb[63].mxu1 }
 0x44f   : > { %v5345_v52 = vpop.eup %5344 }
 0x450   : > { %v3033_v11 = vpop.xlane.xlu0 %3032  ;;  %v3163_v16 = vpack.c.bf16 %v5345_v52, %v5345_v52 }
 0x451   : > { %3047 = vmax.xlane.f32.xlu0 %v3046_v38  ;;  %v3069_v47 = vsub.f32 %v6461_v39, %v3033_v11 }
 0x452   : > { %5098 = vmatmul.mubr.msk.bf16.vlgmr.msra.gmra.mrb[68].mxu1 %vm2279_vm2, %v3163_v16 }
 0x453   : > { %v3090_v17 = vmul.f32 1.442695, %v3069_v47  ;;  %5108 = vmatpush3.bf16.msra.mxu1 %v3411_v54  ;;  %5109 = vmatprep.mubr.msk.bf16.mxu1 %vm5612_vm1, %v5609_v41 }
 0x454   : > { %5119 = vmatprep.subr.bf16.mxu1 %v5609_v41 }
 0x455   : > { %5348 = vpow2.f32 %v3090_v17  ;;  %3053 = vmax.xlane.f32.xlu0 %v3052_v8 }
 0x457   : > { %v5347_v39 = vpop.eup %5346 }
 0x458   : > { %v3036_v19 = vpop.xlane.xlu1 %3035  ;;  %v3124_v0 = vsel %vm2279_vm2, %v5347_v39, 0.0  ;;  %v3164_v29 = vpack.c.bf16 %v5347_v39, %v5347_v39 }
 0x459   : > { %3056 = vmax.xlane.f32.xlu0 %v3055_v44  ;;  %v3070_v48 = vsub.f32 %v6465_v30, %v3036_v19  ;;  %3125 = vadd.xlane.f32.xlu1 %v3124_v0  ;;  %v2270_v30 = vpack.c.bf16 %v6397_v22, %v6397_v22  ;;  %v3121_v22 = vsel %vm2279_vm2, %v5345_v52, 0.0 }
 0x45a   : > { %5104 = vmatmul.mubr.msk.bf16.vlgmr.msra.gmra.mrb[12].mxu0 %vm2279_vm2, %v3164_v29 }
 0x45b   : > { %v3092_v28 = vmul.f32 1.442695, %v3070_v48  ;;  %5114 = vmatpush3.bf16.msra.mxu0 %v3457_v57  ;;  %5115 = vmatprep.mubr.msk.bf16.mxu0 %vm5612_vm1, %v5609_v41  ;;  %v3503_v51 = vsel %vm3179_vm3, %v2270_v30, 0 }
 0x45c   : > { %5125 = vmatprep.subr.bf16.mxu0 %v5609_v41 }
 0x45d   : > { %5350 = vpow2.f32 %v3092_v28  ;;  %3062 = vmax.xlane.f32.xlu0 %v3061_v9 }
 0x45f   : > { %v5349_v4 = vpop.eup %5348 }
 0x460   : > { %v3039_v18 = vpop.xlane.xlu0 %3038  ;;  %v3165_v26 = vpack.c.bf16 %v5349_v4, %v5349_v4  ;;  %v3127_v59 = vsel %vm2279_vm2, %v5349_v4, 0.0 }
 0x461   : > { %3116 = vadd.xlane.f32.xlu0 %v3115_v46  ;;  %v3071_v27 = vsub.f32 %v6469_v21, %v3039_v18 }
 0x462   : > { %5110 = vmatmul.mubr.msk.bf16.vlgmr.msra.gmra.mrb[72].mxu1 %vm2279_vm2, %v3165_v26 }
 0x463   : > { %v3094_v10 = vmul.f32 1.442695, %v3071_v27  ;;  %5120 = vmatpush3.bf16.msra.mxu1 %v3503_v51  ;;  %5121 = vmatprep.mubr.msk.bf16.mxu1 %vm5612_vm1, %v5609_v41 }
 0x464   : > { %5131 = vmatprep.subr.bf16.mxu1 %v5609_v41 }
 0x465   : > { %5352 = vpow2.f32 %v3094_v10  ;;  %3122 = vadd.xlane.f32.xlu0 %v3121_v22 }
 0x467   : > { %v5351_v45 = vpop.eup %5350 }
 0x468   : > { %v3042_v2 = vpop.xlane.xlu1 %3041  ;;  %v3130_v21 = vsel %vm2279_vm2, %v5351_v45, 0.0  ;;  %v3166_v42 = vpack.c.bf16 %v5351_v45, %v5351_v45  ;;  %v1751_v45 = vcombine.low %v6314_v61, %v6485_v14 }
 0x469   : > { %3128 = vadd.xlane.f32.xlu0 %v3127_v59  ;;  %v3072_v35 = vsub.f32 %v6473_v37, %v3042_v2  ;;  %3131 = vadd.xlane.f32.xlu1 %v3130_v21  ;;  %v1902_v37 = vrot.slane %v1888_v13, %v5927_v56  ;;  %v1752_v59 = vcombine.high %v6314_v61, %v6485_v14 }
 0x46a   : > { %5116 = vmatmul.mubr.msk.bf16.vlgmr.msra.gmra.mrb[16].mxu0 %vm2279_vm2, %v3166_v42 }
 0x46b   : > { %v3096_v32 = vmul.f32 1.442695, %v3072_v35  ;;  %5127 = vmatprep.mubr.msk.bf16.mxu0 %vm5612_vm1, %v5609_v41 }
 0x46c   : > { %v1716_v3 = vpop.permute.xlu1 %1715 }
 0x46d   : > { %5354 = vpow2.f32 %v3096_v32  ;;  %v1903_v5 = vcombine.low %v6344_v49, %v1716_v3  ;;  %v1904_v23 = vcombine.high %v6344_v49, %v1716_v3  ;;  %v1759_v32 = vrot.slane %v1751_v45, %v5927_v56 }
 0x46e   : > { %v1766_v3 = vrot.slane %v1752_v59, %v5927_v56 }
 0x46f   : > { %v5353_v24 = vpop.eup %5352  ;;  %v1911_v63 = vrot.slane %v1903_v5, %v5927_v56  ;;  %v1918_v58 = vrot.slane %v1904_v23, %v5927_v56 }
 0x470   : > { %v3133_v33 = vsel %vm2279_vm2, %v5353_v24, 0.0  ;;  %v3167_v7 = vpack.c.bf16 %v5353_v24, %v5353_v24 }
 0x471   : > { %v1951_v25 = vcombine.low %v1895_v6, %v1911_v63  ;;  %v1952_v49 = vcombine.high %v1895_v6, %v1911_v63  ;;  %v1967_v15 = vcombine.low %v1902_v37, %v1918_v58  ;;  %v1968_v52 = vcombine.high %v1902_v37, %v1918_v58  ;;  %3134 = vadd.xlane.f32.xlu0 %v3133_v33 }
 0x472   : > { %5122 = vmatmul.mubr.msk.bf16.vlgmr.msra.gmra.mrb[76].mxu1 %vm2279_vm2, %v3167_v7 }
 0x473   : > { %v1959_v43 = vrot.slane %v1951_v25, %v5933_v62  ;;  %v1966_v38 = vrot.slane %v1952_v49, %v5933_v62  ;;  %v1975_v60 = vrot.slane %v1967_v15, %v5933_v62  ;;  %v1982_v1 = vrot.slane %v1968_v52, %v5933_v62  ;;  %5133 = vmatprep.mubr.msk.bf16.mxu1 %vm5612_vm1, %v5609_v41 }
 0x475   : > { %v4844_v13 = vcombine.low %v1959_v43, %v1966_v38  ;;  %v4846_v11 = vcombine.high %v1959_v43, %v1966_v38  ;;  %v4848_v16 = vcombine.low %v1975_v60, %v1982_v1  ;;  %v4850_v47 = vcombine.high %v1975_v60, %v1982_v1 }
 0x477   : > { %v6597_v54 = vpop.eup %5354  ;;  %v2142_v17 = vrot.slane %v4844_v13, %v5927_v56  ;;  %v2158_v8 = vrot.slane %v4846_v11, %v5927_v56  ;;  %v2174_v36 = vrot.slane %v4848_v16, %v5927_v56  ;;  %v2190_v39 = vrot.slane %v4850_v47, %v5927_v56 }
 0x478   : > { %v3136_v44 = vsel %vm2279_vm2, %v6597_v54, 0.0 }
 0x479   : > { %3137 = vadd.xlane.f32.xlu1 %v3136_v44  ;;  %v2207_v19 = vcombine.low %v2142_v17, %v2158_v8  ;;  %v2239_v0 = vcombine.low %v2174_v36, %v2190_v39  ;;  %v2208_v29 = vcombine.high %v2142_v17, %v2158_v8  ;;  %v2240_v48 = vcombine.high %v2174_v36, %v2190_v39 }
 0x47b   : > { %v2215_v57 = vrot.slane %v2207_v19, %v5933_v62  ;;  %v2247_v28 = vrot.slane %v2239_v0, %v5933_v62  ;;  %v2222_v9 = vrot.slane %v2208_v29, %v5933_v62  ;;  %v2254_v30 = vrot.slane %v2240_v48, %v5933_v62 }
 0x47d   : > { %v2259_v4 = vcombine.low %v2215_v57, %v2247_v28  ;;  %v2260_v46 = vcombine.high %v2215_v57, %v2247_v28  ;;  %v6609_v18 = vcombine.low %v2222_v9, %v2254_v30  ;;  %v6611_v26 = vcombine.high %v2222_v9, %v2254_v30 }
 0x47e   : > { %v3168_v57 = vpack.c.bf16 %v6597_v54, %v6597_v54 }
 0x47f   : > { %v2272_v27 = vpack.c.bf16 %v2259_v4, %v2259_v4  ;;  %v2274_v49 = vpack.c.bf16 %v2260_v46, %v2260_v46  ;;  %v2276_v9 = vpack.c.bf16 %v6609_v18, %v6609_v18 }
 0x481   : > { %v3595_v51 = vsel %vm3179_vm3, %v2272_v27, 0  ;;  %v3687_v8 = vsel %vm3179_vm3, %v2274_v49, 0  ;;  %v3779_v54 = vsel %vm3179_vm3, %v2276_v9, 0 }
 0x482   : > { %5132 = vmatpush3.bf16.msra.mxu1 %v3595_v51 }
 0x483   : > { %5143 = vmatprep.subr.bf16.mxu1 %v5609_v41 }
 0x4a9   : > { %v3045_v10 = vpop.xlane.xlu0 %3044 }
 0x4aa   : > { %v3073_v22 = vsub.f32 %v6479_v50, %v3045_v10 }
 0x4ac   : > { %v3098_v2 = vmul.f32 1.442695, %v3073_v22 }
 0x4ad   : > { %v1714_v21 = vpop.permute.xlu0 %1713 }
 0x4ae   : > { %5356 = vpow2.f32 %v3098_v2  ;;  %v1767_v42 = vcombine.low %v6331_v12, %v1714_v21  ;;  %v1768_v35 = vcombine.high %v6331_v12, %v1714_v21 }
 0x4b0   : > { %v1775_v5 = vrot.slane %v1767_v42, %v5927_v56  ;;  %v1782_v50 = vrot.slane %v1768_v35, %v5927_v56 }
 0x4b2   : > { %v1815_v23 = vcombine.low %v1759_v32, %v1775_v5  ;;  %v1816_v24 = vcombine.high %v1759_v32, %v1775_v5  ;;  %v1831_v6 = vcombine.low %v1766_v3, %v1782_v50  ;;  %v1832_v37 = vcombine.high %v1766_v3, %v1782_v50 }
 0x4b4   : > { %v1823_v61 = vrot.slane %v1815_v23, %v5933_v62  ;;  %v1830_v14 = vrot.slane %v1816_v24, %v5933_v62  ;;  %v1839_v63 = vrot.slane %v1831_v6, %v5933_v62  ;;  %v1846_v12 = vrot.slane %v1832_v37, %v5933_v62 }
 0x4b6   : > { %v4836_v58 = vcombine.low %v1823_v61, %v1830_v14  ;;  %v4838_v33 = vcombine.high %v1823_v61, %v1830_v14  ;;  %v4840_v7 = vcombine.low %v1839_v63, %v1846_v12  ;;  %v4842_v25 = vcombine.high %v1839_v63, %v1846_v12 }
 0x4b8   : > { %v5357_v15 = vpop.eup %5356  ;;  %v2006_v52 = vrot.slane %v4836_v58, %v5927_v56  ;;  %v2022_v43 = vrot.slane %v4838_v33, %v5927_v56  ;;  %v2038_v38 = vrot.slane %v4840_v7, %v5927_v56  ;;  %v2054_v60 = vrot.slane %v4842_v25, %v5927_v56 }
 0x4b9   : > { %v3051_v1 = vpop.xlane.xlu1 %3050  ;;  %v3139_v13 = vsel %vm2279_vm2, %v5357_v15, 0.0  ;;  %v3169_v11 = vpack.c.bf16 %v5357_v15, %v5357_v15  ;;  %v2278_v7 = vpack.c.bf16 %v6611_v26, %v6611_v26 }
 0x4ba   : > { %v3075_v16 = vsub.f32 %v6488_v31, %v3051_v1  ;;  %3140 = vadd.xlane.f32.xlu0 %v3139_v13  ;;  %v2071_v47 = vcombine.low %v2006_v52, %v2022_v43  ;;  %v2103_v17 = vcombine.low %v2038_v38, %v2054_v60  ;;  %v2072_v10 = vcombine.high %v2006_v52, %v2022_v43 }
 0x4bb   : > { %5134 = vmatmul.mubr.msk.bf16.vlgmr.msra.gmra.mrb[80].mxu1 %vm2279_vm2, %v3169_v11  ;;  %v2104_v22 = vcombine.high %v2038_v38, %v2054_v60  ;;  %v3871_v60 = vsel %vm3179_vm3, %v2278_v7, 0 }
 0x4bc   : > { %v3102_v36 = vmul.f32 1.442695, %v3075_v16  ;;  %5144 = vmatpush3.bf16.msra.mxu1 %v3687_v8  ;;  %v2079_v39 = vrot.slane %v2071_v47, %v5933_v62  ;;  %v2111_v44 = vrot.slane %v2103_v17, %v5933_v62  ;;  %5145 = vmatprep.mubr.msk.bf16.mxu1 %vm5612_vm1, %v5609_v41  ;;  %v2086_v42 = vrot.slane %v2072_v10, %v5933_v62 }
 0x4bd   : > { %5155 = vmatprep.subr.bf16.mxu1 %v5609_v41  ;;  %v2118_v35 = vrot.slane %v2104_v22, %v5933_v62 }
 0x4be   : > { %5358 = vpow2.f32 %v3102_v36  ;;  %v2123_v31 = vcombine.low %v2079_v39, %v2111_v44  ;;  %v2124_v19 = vcombine.high %v2079_v39, %v2111_v44 }
 0x4c0   : > { %v2271_v0 = vpack.c.bf16 %v2123_v31, %v2123_v31  ;;  %v2273_v48 = vpack.c.bf16 %v2124_v19, %v2124_v19 }
 0x4c2   : > { %v3549_v29 = vsel %vm3179_vm3, %v2271_v0, 0  ;;  %v3641_v28 = vsel %vm3179_vm3, %v2273_v48, 0 }
 0x4c3   : > { %5126 = vmatpush3.bf16.msra.mxu0 %v3549_v29 }
 0x4c4   : > { %5137 = vmatprep.subr.bf16.mxu0 %v5609_v41 }
 0x4c6   : > { %5128 = vmatmul.mubr.msk.bf16.vlgmr.msra.gmra.mrb[20].mxu0 %vm2279_vm2, %v3168_v57 }
 0x4c7   : > { %5138 = vmatpush3.bf16.msra.mxu0 %v3641_v28  ;;  %5139 = vmatprep.mubr.msk.bf16.mxu0 %vm5612_vm1, %v5609_v41 }
 0x4c8   : > { %v5359_v30 = vpop.eup %5358  ;;  %5149 = vmatprep.subr.bf16.mxu0 %v5609_v41 }
 0x4c9   : > { %v3145_v4 = vsel %vm2279_vm2, %v5359_v30, 0.0  ;;  %v3171_v46 = vpack.c.bf16 %v5359_v30, %v5359_v30 }
 0x4ca   : > { %3146 = vadd.xlane.f32.xlu0 %v3145_v4 }
 0x4cb   : > { %5146 = vmatmul.mubr.msk.bf16.vlgmr.msra.gmra.mrb[84].mxu1 %vm2279_vm2, %v3171_v46 }
 0x4cc   : > { %5156 = vmatpush3.bf16.msra.mxu1 %v3779_v54  ;;  %5157 = vmatprep.mubr.msk.bf16.mxu1 %vm5612_vm1, %v5609_v41 }
 0x4cd   : > { %5167 = vmatprep.subr.bf16.mxu1 %v5609_v41 }
 0x4d1   : > { %v3060_v18 = vpop.xlane.xlu1 %3059 }
 0x4d2   : > { %v3078_v45 = vsub.f32 %v6514_v34, %v3060_v18 }
 0x4d4   : > { %v3108_v32 = vmul.f32 1.442695, %v3078_v45 }
 0x4d5   : > { %v3114_v39 = vpop.xlane.xlu1 %3113 }
 0x4d9   : > { %v3120_v0 = vpop.xlane.xlu1 %3119 }
 0x4de   : > { %v3048_v27 = vpop.xlane.xlu0 %3047 }
 0x4df   : > { %v3074_v51 = vsub.f32 %v6483_v40, %v3048_v27  ;;  %v2125_v40 = vcombine.low %v2086_v42, %v2118_v35 }
 0x4e1   : > { %v3100_v59 = vmul.f32 1.442695, %v3074_v51  ;;  %v2275_v6 = vpack.c.bf16 %v2125_v40, %v2125_v40 }
 0x4e2   : > { %v3054_v2 = vpop.xlane.xlu0 %3053 }
 0x4e3   : > { %5360 = vpow2.f32 %v3100_v59  ;;  %v3076_v21 = vsub.f32 %v6493_v53, %v3054_v2  ;;  %v3733_v63 = vsel %vm3179_vm3, %v2275_v6, 0 }
 0x4e5   : > { %v3104_v3 = vmul.f32 1.442695, %v3076_v21 }
 0x4e6   : > { %v3057_v5 = vpop.xlane.xlu0 %3056  ;;  %v3126_v9 = vpop.xlane.xlu1 %3125 }
 0x4e7   : > { %5362 = vpow2.f32 %v3104_v3  ;;  %v3077_v50 = vsub.f32 %v6502_v20, %v3057_v5  ;;  %v2126_v20 = vcombine.high %v2086_v42, %v2118_v35 }
 0x4e8   : > { %5364 = vpow2.f32 %v3108_v32 }
 0x4e9   : > { %v3106_v23 = vmul.f32 1.442695, %v3077_v50  ;;  %v2277_v33 = vpack.c.bf16 %v2126_v20, %v2126_v20 }
 0x4ea   : > { %v3063_v24 = vpop.xlane.xlu0 %3062 }
 0x4eb   : > { %5366 = vpow2.f32 %v3106_v23  ;;  %v3079_v34 = vsub.f32 %v6528_v55, %v3063_v24  ;;  %v3825_v38 = vsel %vm3179_vm3, %v2277_v33, 0 }
 0x4ed   : > { %v5361_v37 = vpop.eup %5360  ;;  %v3110_v53 = vmul.f32 1.442695, %v3079_v34 }
 0x4ee   : > { %v3142_v61 = vsel %vm2279_vm2, %v5361_v37, 0.0  ;;  %v3170_v14 = vpack.c.bf16 %v5361_v37, %v5361_v37  ;;  %v3117_v29 = vpop.xlane.xlu0 %3116 }
 0x4ef   : > { %5368 = vpow2.f32 %v3110_v53  ;;  %3143 = vadd.xlane.f32.xlu1 %v3142_v61 }
 0x4f0   : > { %5140 = vmatmul.mubr.msk.bf16.vlgmr.msra.gmra.mrb[24].mxu0 %vm2279_vm2, %v3170_v14  ;;  %5370 = vrcp.f32 %v3114_v39 }
 0x4f1   : > { %v5363_v12 = vpop.eup %5362  ;;  %5150 = vmatpush3.bf16.msra.mxu0 %v3733_v63  ;;  %5151 = vmatprep.mubr.msk.bf16.mxu0 %vm5612_vm1, %v5609_v41  ;;  %5372 = vrcp.f32 %v3126_v9 }
 0x4f2   : > { %v3148_v55 = vsel %vm2279_vm2, %v5363_v12, 0.0  ;;  %5161 = vmatprep.subr.bf16.mxu0 %v5609_v41  ;;  %v5365_v58 = vpop.eup %5364  ;;  %v3172_v52 = vpack.c.bf16 %v5363_v12, %v5363_v12  ;;  %v3123_v4 = vpop.xlane.xlu0 %3122  ;;  %5374 = vrcp.f32 %v3117_v29 }
 0x4f3   : > { %3149 = vadd.xlane.f32.xlu1 %v3148_v55  ;;  %v3154_v15 = vsel %vm2279_vm2, %v5365_v58, 0.0  ;;  %v3174_v13 = vpack.c.bf16 %v5365_v58, %v5365_v58 }
 0x4f5   : > { %v5367_v25 = vpop.eup %5366 }
 0x4f6   : > { %v3151_v49 = vsel %vm2279_vm2, %v5367_v25, 0.0  ;;  %v3173_v43 = vpack.c.bf16 %v5367_v25, %v5367_v25  ;;  %v3129_v27 = vpop.xlane.xlu0 %3128  ;;  %v3132_v35 = vpop.xlane.xlu1 %3131 }
 0x4f7   : > { %3152 = vadd.xlane.f32.xlu0 %v3151_v49  ;;  %3155 = vadd.xlane.f32.xlu1 %v3154_v15  ;;  %5376 = vrcp.f32 %v3129_v27 }
 0x4f8   : > { %5152 = vmatmul.mubr.msk.bf16.vlgmr.msra.gmra.mrb[28].mxu0 %vm2279_vm2, %v3172_v52  ;;  %5158 = vmatmul.mubr.msk.bf16.vlgmr.msra.gmra.mrb[88].mxu1 %vm2279_vm2, %v3173_v43  ;;  %5378 = vrcp.f32 %v3120_v0 }
 0x4f9   : > { %v5369_v1 = vpop.eup %5368  ;;  %5162 = vmatpush3.bf16.msra.mxu0 %v3825_v38  ;;  %5168 = vmatpush3.bf16.msra.mxu1 %v3871_v60  ;;  %5380 = vrcp.f32 %v3132_v35 }
 0x4fa   : > { %v3157_v26 = vsel %vm2279_vm2, %v5369_v1, 0.0  ;;  %5163 = vmatprep.mubr.msk.bf16.mxu0 %vm5612_vm1, %v5609_v41  ;;  %5169 = vmatprep.mubr.msk.bf16.mxu1 %vm5612_vm1, %v5609_v41  ;;  %v3175_v11 = vpack.c.bf16 %v5369_v1, %v5369_v1  ;;  %v5371_v10 = vpop.eup %5370  ;;  %5382 = vrcp.f32 %v3123_v4 }
 0x4fb   : > { %3158 = vadd.xlane.f32.xlu0 %v3157_v26  ;;  %5173 = vmatprep.subr.bf16.mxu0 %v5609_v41  ;;  %v5373_v22 = vpop.eup %5372 }
 0x4fc   : > { %v5375_v50 = vpop.eup %5374 }
 0x4fe   : > { %v3135_v63 = vpop.xlane.xlu0 %3134 }
 0x4ff   : > { %5384 = vrcp.f32 %v3135_v63 }
 0x500   : > { %5164 = vmatmul.mubr.msk.bf16.vlgmr.msra.gmra.mrb[32].mxu0 %vm2279_vm2, %v3174_v13  ;;  %5170 = vmatmul.mubr.msk.bf16.vlgmr.msra.gmra.mrb[92].mxu1 %vm2279_vm2, %v3175_v11 }
 0x501   : > { %5181 = vmatprep.mubr.msk.bf16.mxu0 %vm5612_vm1, %v5609_v41  ;;  %v5377_v40 = vpop.eup %5376 }
 0x502   : > { %v5379_v20 = vpop.eup %5378 }
 0x503   : > { %v5381_v12 = vpop.eup %5380 }
 0x50d   : > { %v3217_v16 = vpop.f32.mrb[4].mxu0 }
 0x50e   : > { %v5081_v47 = vpop.f32.mrb[5].mxu0  ;;  %v3929_v59 = vmul.f32 %v5371_v10, %v3217_v16 }
 0x50f   : > { %v3220_v17 = vpop.f32.mrb[6].mxu0  ;;  %v5383_v47 = vpop.eup %5382 }
 0x510   : > { %v5082_v8 = vpop.f32.mrb[7].mxu0 }
 0x511   : > { %v5385_v8 = vpop.eup %5384 }
 0x515   : > { %v3263_v36 = vpop.f32.mrb[64].mxu1 }
 0x516   : > { %v5087_v44 = vpop.f32.mrb[65].mxu1  ;;  %v3930_v24 = vmul.f32 %v5375_v50, %v3263_v36 }
 0x517   : > { %v3266_v31 = vpop.f32.mrb[66].mxu1 }
 0x518   : > { %v5088_v19 = vpop.f32.mrb[67].mxu1 }
 0x51d   : > { %v3309_v48 = vpop.f32.mrb[8].mxu0 }
 0x51e   : > { %v5093_v57 = vpop.f32.mrb[9].mxu0  ;;  %v3931_v58 = vmul.f32 %v5379_v20, %v3309_v48 }
 0x51f   : > { %v3312_v28 = vpop.f32.mrb[10].mxu0 }
 0x520   : > { %v5094_v30 = vpop.f32.mrb[11].mxu0 }
 0x525   : > { %v3355_v46 = vpop.f32.mrb[68].mxu1 }
 0x526   : > { %v5099_v54 = vpop.f32.mrb[69].mxu1  ;;  %v3932_v0 = vmul.f32 %v5383_v47, %v3355_v46 }
 0x527   : > { %v3358_v18 = vpop.f32.mrb[70].mxu1 }
 0x528   : > { %v5100_v51 = vpop.f32.mrb[71].mxu1 }
 0x52d   : > { %v3401_v45 = vpop.f32.mrb[12].mxu0 }
 0x52e   : > { %v3933_v2 = vmul.f32 %v5373_v22, %v3401_v45  ;;  %v5105_v21 = vpop.f32.mrb[13].mxu0 }
 0x52f   : > { %v3404_v42 = vpop.f32.mrb[14].mxu0 }
 0x530   : > { %v3945_v32 = vcombine.low %v3929_v59, %v3933_v2  ;;  %v3946_v3 = vcombine.high %v3929_v59, %v3933_v2  ;;  %v5106_v5 = vpop.f32.mrb[15].mxu0 }
 0x532   : > { %v3953_v43 = vrot.slane %v3945_v32, %v5927_v56  ;;  %v3960_v38 = vrot.slane %v3946_v3, %v5927_v56 }
 0x535   : > { %v3447_v23 = vpop.f32.mrb[72].mxu1 }
 0x536   : > { %v3934_v34 = vmul.f32 %v5377_v40, %v3447_v23  ;;  %v5111_v6 = vpop.f32.mrb[73].mxu1 }
 0x537   : > { %v3450_v37 = vpop.f32.mrb[74].mxu1 }
 0x538   : > { %v4081_v53 = vcombine.low %v3930_v24, %v3934_v34  ;;  %v4082_v61 = vcombine.high %v3930_v24, %v3934_v34  ;;  %v5112_v14 = vpop.f32.mrb[75].mxu1 }
 0x53a   : > { %v4089_v45 = vrot.slane %v4081_v53, %v5927_v56  ;;  %v4096_v46 = vrot.slane %v4082_v61, %v5927_v56 }
 0x53d   : > { %v3493_v55 = vpop.f32.mrb[16].mxu0 }
 0x53e   : > { %v3935_v33 = vmul.f32 %v5381_v12, %v3493_v55  ;;  %v5117_v7 = vpop.f32.mrb[17].mxu0 }
 0x53f   : > { %v3496_v25 = vpop.f32.mrb[18].mxu0 }
 0x540   : > { %v3961_v49 = vcombine.low %v3931_v58, %v3935_v33  ;;  %v3962_v15 = vcombine.high %v3931_v58, %v3935_v33  ;;  %v5118_v52 = vpop.f32.mrb[19].mxu0 }
 0x542   : > { %v3969_v60 = vrot.slane %v3961_v49, %v5927_v56  ;;  %v3976_v1 = vrot.slane %v3962_v15, %v5927_v56 }
 0x544   : > { %v4009_v26 = vcombine.low %v3953_v43, %v3969_v60  ;;  %v4010_v13 = vcombine.high %v3953_v43, %v3969_v60  ;;  %v4025_v11 = vcombine.low %v3960_v38, %v3976_v1  ;;  %v4026_v16 = vcombine.high %v3960_v38, %v3976_v1 }
 0x545   : > { %v3539_v17 = vpop.f32.mrb[76].mxu1 }
 0x546   : > { %v4017_v36 = vrot.slane %v4009_v26, %v5933_v62  ;;  %v4024_v39 = vrot.slane %v4010_v13, %v5933_v62  ;;  %v4033_v44 = vrot.slane %v4025_v11, %v5933_v62  ;;  %v4040_v31 = vrot.slane %v4026_v16, %v5933_v62  ;;  %v5123_v19 = vpop.f32.mrb[77].mxu1 }
 0x547   : > { %v3936_v29 = vmul.f32 %v5385_v8, %v3539_v17  ;;  %v3542_v48 = vpop.f32.mrb[78].mxu1 }
 0x548   : > { %v4883_v57 = vcombine.low %v4017_v36, %v4024_v39  ;;  %v4885_v28 = vcombine.high %v4017_v36, %v4024_v39  ;;  %v4887_v9 = vcombine.low %v4033_v44, %v4040_v31  ;;  %v4889_v30 = vcombine.high %v4033_v44, %v4040_v31  ;;  %v5124_v4 = vpop.f32.mrb[79].mxu1  ;;  %v5335_v48 = vld [vmem:[#allocation7 + $0x8] sm:$0xff]  }
 0x549   : > { %v4097_v54 = vcombine.low %v3932_v0, %v3936_v29  ;;  %v4098_v18 = vcombine.high %v3932_v0, %v3936_v29  ;;  %v5334_v0 = vld [vmem:[#allocation7] sm:$0xff]  }
 0x54a   : > { %v4225_v27 = vrot.slane %v4883_v57, %v5927_v56  ;;  %v4241_v51 = vrot.slane %v4885_v28, %v5927_v56  ;;  %v4257_v10 = vrot.slane %v4887_v9, %v5927_v56  ;;  %v4273_v22 = vrot.slane %v4889_v30, %v5927_v56  ;;  %v5336_v28 = vld [vmem:[#allocation7 + $0x10] sm:$0xff]  }
 0x54b   : > { %v4105_v59 = vrot.slane %v4097_v54, %v5927_v56  ;;  %v4112_v2 = vrot.slane %v4098_v18, %v5927_v56  ;;  %v4605_v29 = vsel %vm348_vm0, %v5334_v0, 0  ;;  %v4608_v57 = vsel %vm348_vm0, %v5335_v48, 0 }
 0x54c   : > { %v4282_v21 = vcombine.high %v4225_v27, %v4241_v51  ;;  %v4314_v42 = vcombine.high %v4257_v10, %v4273_v22  ;;  %v4281_v35 = vcombine.low %v4225_v27, %v4241_v51  ;;  %v4313_v32 = vcombine.low %v4257_v10, %v4273_v22  ;;  %5174 = vmatpush3.bf16.xpose.msra.mxu0 %v4605_v29 }
 0x54d   : > { %v4145_v3 = vcombine.low %v4089_v45, %v4105_v59  ;;  %v4146_v5 = vcombine.high %v4089_v45, %v4105_v59  ;;  %v4161_v50 = vcombine.low %v4096_v46, %v4112_v2  ;;  %v4162_v40 = vcombine.high %v4096_v46, %v4112_v2  ;;  %5175 = vmatprep.subr.bf16.mxu0 %v5609_v41 }
 0x54e   : > { %v4296_v23 = vrot.slane %v4282_v21, %v5933_v62  ;;  %v4328_v24 = vrot.slane %v4314_v42, %v5933_v62  ;;  %v6711_v34 = vrot.slane %v4281_v35, %v5933_v62  ;;  %v6714_v6 = vrot.slane %v4313_v32, %v5933_v62  ;;  %v3138_v21 = vpop.xlane.xlu1 %3137  ;;  %v3141_v42 = vpop.xlane.xlu0 %3140 }
 0x54f   : > { %v4153_v37 = vrot.slane %v4145_v3, %v5933_v62  ;;  %v4160_v53 = vrot.slane %v4146_v5, %v5933_v62  ;;  %v4169_v61 = vrot.slane %v4161_v50, %v5933_v62  ;;  %v4176_v14 = vrot.slane %v4162_v40, %v5933_v62 }
 0x550   : > { %v4347_v63 = vcombine.low %v4296_v23, %v4328_v24  ;;  %v4346_v20 = vcombine.high %v6711_v34, %v6714_v6  ;;  %v4345_v12 = vcombine.low %v6711_v34, %v6714_v6  ;;  %v4348_v55 = vcombine.high %v4296_v23, %v4328_v24 }
 0x551   : > { %v4891_v58 = vcombine.low %v4153_v37, %v4160_v53  ;;  %v4893_v33 = vcombine.high %v4153_v37, %v4160_v53  ;;  %v4895_v7 = vcombine.low %v4169_v61, %v4176_v14  ;;  %v4897_v25 = vcombine.high %v4169_v61, %v4176_v14 }
 0x552   : > { %v4611_v9 = vsel %vm348_vm0, %v5336_v28, 0  ;;  %5386 = vrcp.f32 %v3138_v21 }
 0x553   : > { %v4361_v49 = vrot.slane %v4891_v58, %v5927_v56  ;;  %v4377_v15 = vrot.slane %v4893_v33, %v5927_v56  ;;  %v4393_v52 = vrot.slane %v4895_v7, %v5927_v56  ;;  %v4409_v43 = vrot.slane %v4897_v25, %v5927_v56 }
 0x554   : > { %5176 = vmatpush3.bf16.xpose.msra.mxu0 %v4608_v57  ;;  %5388 = vrcp.f32 %v3141_v42 }
 0x555   : > { %v4418_v38 = vcombine.high %v4361_v49, %v4377_v15  ;;  %v4450_v60 = vcombine.high %v4393_v52, %v4409_v43  ;;  %v4417_v1 = vcombine.low %v4361_v49, %v4377_v15  ;;  %v4449_v26 = vcombine.low %v4393_v52, %v4409_v43  ;;  %5177 = vmatprep.subr.bf16.mxu0 %v5609_v41 }
 0x557   : > { %v4432_v13 = vrot.slane %v4418_v38, %v5933_v62  ;;  %v4464_v11 = vrot.slane %v4450_v60, %v5933_v62  ;;  %v6731_v16 = vrot.slane %v4417_v1, %v5933_v62  ;;  %v6734_v47 = vrot.slane %v4449_v26, %v5933_v62  ;;  %v3147_v32 = vpop.xlane.xlu0 %3146 }
 0x559   : > { %v4483_v17 = vcombine.low %v4432_v13, %v4464_v11  ;;  %v4481_v8 = vcombine.low %v6731_v16, %v6734_v47  ;;  %v4482_v36 = vcombine.high %v6731_v16, %v6734_v47  ;;  %v4484_v39 = vcombine.high %v4432_v13, %v4464_v11 }
 0x55b   : > { %v5292_v44 = vpack.i.bf16 %v4483_v17, %v4347_v63  ;;  %v5287_v31 = vpack.i.bf16 %v4482_v36, %v4346_v20  ;;  %v5297_v19 = vpack.i.bf16 %v4484_v39, %v4348_v55 }
 0x55c   : > { %5178 = vmatpush3.bf16.xpose.msra.mxu0 %v4611_v9  ;;  %v5387_v53 = vpop.eup %5386 }
 0x55d   : > { %5293 = vrot.lane.b32.xlu0 %v5292_v44, %s5613_s30  ;;  %5288 = vrot.lane.b32.xlu1 %v5287_v31, %s5614_s27  ;;  %s5522_s30 = scalar_lea.vmem %s5521_s13, 512 }
 0x55e   : > { %5179 = vmatprep.subr.bf16.mxu0 %v5609_v41  ;;  %v5389_v61 = vpop.eup %5388  ;;  %p5524_p2 = scmp.lt.s32.totalorder %s5522_s30, %s5516_s9 }
 0x560   : > { %p5525_p1 = por %p5524_p2, %p5523_p12 }
 0x561   : > { %5298 = vrot.lane.b32.xlu1 %v5297_v19, %s5615_s29 }
 0x562   : > { %p5526_p4 = pnand %p5525_p1, %p5519_p7 }
 0x57c   : > { %v3144_v35 = vpop.xlane.xlu1 %3143 }
 0x580   : > { %v3150_v3 = vpop.xlane.xlu1 %3149 }
 0x581   : > { %5390 = vrcp.f32 %v3150_v3 }
 0x584   : > { %v3153_v5 = vpop.xlane.xlu0 %3152  ;;  %v3156_v40 = vpop.xlane.xlu1 %3155 }
 0x585   : > { %5392 = vrcp.f32 %v3153_v5 }
 0x586   : > { %5394 = vrcp.f32 %v3147_v32 }
 0x587   : > { %5396 = vrcp.f32 %v3144_v35 }
 0x588   : > { %v3159_v24 = vpop.xlane.xlu0 %3158  ;;  %5398 = vrcp.f32 %v3156_v40 }
 0x589   : > { %5400 = vrcp.f32 %v3159_v24 }
 0x58b   : > { %v5391_v14 = vpop.eup %5390 }
 0x58e   : > { %v3631_v30 = vpop.f32.mrb[80].mxu1 }
 0x58f   : > { %v5135_v4 = vpop.f32.mrb[81].mxu1  ;;  %v5393_v63 = vpop.eup %5392  ;;  %v3938_v58 = vmul.f32 %v5389_v61, %v3631_v30 }
 0x590   : > { %v3634_v54 = vpop.f32.mrb[82].mxu1  ;;  %v5395_v17 = vpop.eup %5394 }
 0x591   : > { %v5136_v18 = vpop.f32.mrb[83].mxu1  ;;  %v5397_v36 = vpop.eup %5396 }
 0x592   : > { %v5399_v39 = vpop.eup %5398 }
 0x593   : > { %v5401_v44 = vpop.eup %5400 }
 0x599   : > { %v3585_v27 = vpop.f32.mrb[20].mxu0 }
 0x59a   : > { %v5129_v51 = vpop.f32.mrb[21].mxu0  ;;  %v3937_v33 = vmul.f32 %v5387_v53, %v3585_v27 }
 0x59b   : > { %v3588_v10 = vpop.f32.mrb[22].mxu0 }
 0x59c   : > { %v5130_v22 = vpop.f32.mrb[23].mxu0 }
 0x59e   : > { %v3723_v45 = vpop.f32.mrb[84].mxu1 }
 0x59f   : > { %v5147_v46 = vpop.f32.mrb[85].mxu1  ;;  %v3940_v0 = vmul.f32 %v5395_v17, %v3723_v45 }
 0x5a0   : > { %v3726_v59 = vpop.f32.mrb[86].mxu1 }
 0x5a1   : > { %v5148_v2 = vpop.f32.mrb[87].mxu1 }
 0x5c3   : > { %v3677_v41 = vpop.f32.mrb[24].mxu0 }
 0x5c4   : > { %v5141_v50 = vpop.f32.mrb[25].mxu0  ;;  %v3939_v29 = vmul.f32 %v5397_v36, %v3677_v41 }
 0x5c5   : > { %v3680_v23 = vpop.f32.mrb[26].mxu0 }
 0x5c6   : > { %v5142_v37 = vpop.f32.mrb[27].mxu0 }
 0x5cb   : > { %v3769_v20 = vpop.f32.mrb[28].mxu0  ;;  %v3815_v55 = vpop.f32.mrb[88].mxu1 }
 0x5cc   : > { %v3941_v7 = vmul.f32 %v5391_v14, %v3769_v20  ;;  %v3942_v25 = vmul.f32 %v5393_v63, %v3815_v55  ;;  %v5153_v49 = vpop.f32.mrb[29].mxu0  ;;  %v5159_v15 = vpop.f32.mrb[89].mxu1 }
 0x5cd   : > { %v3772_v52 = vpop.f32.mrb[30].mxu0  ;;  %v3818_v43 = vpop.f32.mrb[90].mxu1 }
 0x5ce   : > { %v3977_v38 = vcombine.low %v3937_v33, %v3941_v7  ;;  %v3978_v60 = vcombine.high %v3937_v33, %v3941_v7  ;;  %v4113_v1 = vcombine.low %v3938_v58, %v3942_v25  ;;  %v4114_v26 = vcombine.high %v3938_v58, %v3942_v25  ;;  %v5154_v13 = vpop.f32.mrb[31].mxu0  ;;  %v5160_v11 = vpop.f32.mrb[91].mxu1 }
 0x5d0   : > { %v3985_v22 = vrot.slane %v3977_v38, %v5927_v56  ;;  %v3992_v46 = vrot.slane %v3978_v60, %v5927_v56  ;;  %v4121_v35 = vrot.slane %v4113_v1, %v5927_v56  ;;  %v4128_v32 = vrot.slane %v4114_v26, %v5927_v56 }
 0x5d3   : > { %v3861_v31 = vpop.f32.mrb[32].mxu0  ;;  %v3907_v19 = vpop.f32.mrb[92].mxu1 }
 0x5d4   : > { %v3943_v48 = vmul.f32 %v5399_v39, %v3861_v31  ;;  %v3944_v57 = vmul.f32 %v5401_v44, %v3907_v19  ;;  %v5165_v28 = vpop.f32.mrb[33].mxu0  ;;  %v5171_v9 = vpop.f32.mrb[93].mxu1 }
 0x5d5   : > { %v3864_v30 = vpop.f32.mrb[34].mxu0  ;;  %v3910_v51 = vpop.f32.mrb[94].mxu1 }
 0x5d6   : > { %v3993_v4 = vcombine.low %v3939_v29, %v3943_v48  ;;  %v3994_v54 = vcombine.high %v3939_v29, %v3943_v48  ;;  %v4129_v18 = vcombine.low %v3940_v0, %v3944_v57  ;;  %v4130_v27 = vcombine.high %v3940_v0, %v3944_v57  ;;  %v5166_v10 = vpop.f32.mrb[35].mxu0  ;;  %v5172_v59 = vpop.f32.mrb[95].mxu1 }
 0x5d8   : > { %v4001_v2 = vrot.slane %v3993_v4, %v5927_v56  ;;  %v4008_v45 = vrot.slane %v3994_v54, %v5927_v56  ;;  %v4137_v21 = vrot.slane %v4129_v18, %v5927_v56  ;;  %v4144_v42 = vrot.slane %v4130_v27, %v5927_v56  ;;  %v5337_v27 = vld [vmem:[#allocation7 + $0x18] sm:$0xff]  }
 0x5da   : > { %v4041_v3 = vcombine.low %v3985_v22, %v4001_v2  ;;  %v4042_v5 = vcombine.high %v3985_v22, %v4001_v2  ;;  %v4057_v41 = vcombine.low %v3992_v46, %v4008_v45  ;;  %v4058_v50 = vcombine.high %v3992_v46, %v4008_v45 }
 0x5db   : > { %v4177_v40 = vcombine.low %v4121_v35, %v4137_v21  ;;  %v4178_v23 = vcombine.high %v4121_v35, %v4137_v21  ;;  %v4193_v24 = vcombine.low %v4128_v32, %v4144_v42  ;;  %v4194_v37 = vcombine.high %v4128_v32, %v4144_v42 }
 0x5dc   : > { %v4049_v53 = vrot.slane %v4041_v3, %v5933_v62  ;;  %v4056_v61 = vrot.slane %v4042_v5, %v5933_v62  ;;  %v4065_v14 = vrot.slane %v4057_v41, %v5933_v62  ;;  %v4072_v63 = vrot.slane %v4058_v50, %v5933_v62 }
 0x5dd   : > { %v4185_v20 = vrot.slane %v4177_v40, %v5933_v62  ;;  %v4192_v55 = vrot.slane %v4178_v23, %v5933_v62  ;;  %v4201_v58 = vrot.slane %v4193_v24, %v5933_v62  ;;  %v4208_v33 = vrot.slane %v4194_v37, %v5933_v62  ;;  %v5294_v23 = vpop.permute.xlu0 %5293 }
 0x5de   : > { %v4884_v7 = vcombine.low %v4049_v53, %v4056_v61  ;;  %v4886_v25 = vcombine.high %v4049_v53, %v4056_v61  ;;  %v4888_v49 = vcombine.low %v4065_v14, %v4072_v63  ;;  %v4890_v15 = vcombine.high %v4065_v14, %v4072_v63 }
 0x5df   : > { %v4892_v52 = vcombine.low %v4185_v20, %v4192_v55  ;;  %v4894_v43 = vcombine.high %v4185_v20, %v4192_v55  ;;  %v4896_v38 = vcombine.low %v4201_v58, %v4208_v33  ;;  %v4898_v60 = vcombine.high %v4201_v58, %v4208_v33 }
 0x5e0   : > { %v4232_v1 = vrot.slane %v4884_v7, %v5927_v56  ;;  %v4248_v26 = vrot.slane %v4886_v25, %v5927_v56  ;;  %v4264_v13 = vrot.slane %v4888_v49, %v5927_v56  ;;  %v4280_v11 = vrot.slane %v4890_v15, %v5927_v56 }
 0x5e1   : > { %v4368_v17 = vrot.slane %v4892_v52, %v5927_v56  ;;  %v4384_v36 = vrot.slane %v4894_v43, %v5927_v56  ;;  %v4400_v39 = vrot.slane %v4896_v38, %v5927_v56  ;;  %v4416_v44 = vrot.slane %v4898_v60, %v5927_v56 }
 0x5e2   : > { %v4297_v31 = vcombine.low %v4232_v1, %v4248_v26  ;;  %v4329_v19 = vcombine.low %v4264_v13, %v4280_v11  ;;  %v4298_v0 = vcombine.high %v4232_v1, %v4248_v26  ;;  %v4330_v29 = vcombine.high %v4264_v13, %v4280_v11 }
 0x5e3   : > { %v4433_v48 = vcombine.low %v4368_v17, %v4384_v36  ;;  %v4465_v57 = vcombine.low %v4400_v39, %v4416_v44  ;;  %v4434_v28 = vcombine.high %v4368_v17, %v4384_v36  ;;  %v4466_v9 = vcombine.high %v4400_v39, %v4416_v44 }
 0x5e4   : > { %v4305_v30 = vrot.slane %v4297_v31, %v5933_v62  ;;  %v4337_v4 = vrot.slane %v4329_v19, %v5933_v62  ;;  %v4312_v54 = vrot.slane %v4298_v0, %v5933_v62  ;;  %v4344_v18 = vrot.slane %v4330_v29, %v5933_v62  ;;  %v4899_v0 = vld [vmem:[#allocation8] ss:$0 sm:$0xff] }
 0x5e5   : > { %v4441_v51 = vrot.slane %v4433_v48, %v5933_v62  ;;  %v4473_v56 = vrot.slane %v4465_v57, %v5933_v62  ;;  %v4448_v10 = vrot.slane %v4434_v28, %v5933_v62  ;;  %v4480_v22 = vrot.slane %v4466_v9, %v5933_v62  ;;  %v5289_v62 = vpop.permute.xlu1 %5288 }
 0x5e6   : > { %v4350_v46 = vcombine.high %v4305_v30, %v4337_v4  ;;  %v4349_v59 = vcombine.low %v4305_v30, %v4337_v4  ;;  %v4352_v2 = vcombine.high %v4312_v54, %v4344_v18  ;;  %v4351_v45 = vcombine.low %v4312_v54, %v4344_v18 }
 0x5e7   : > { %v4486_v21 = vcombine.high %v4441_v51, %v4473_v56  ;;  %v4485_v42 = vcombine.low %v4441_v51, %v4473_v56  ;;  %v4488_v35 = vcombine.high %v4448_v10, %v4480_v22  ;;  %v4487_v32 = vcombine.low %v4448_v10, %v4480_v22 }
 0x5e8   : > { %v4614_v3 = vsel %vm348_vm0, %v5337_v27, 0  ;;  %v5291_v24 = vunpack.i.h.bf16 %v5289_v62  ;;  %v5290_v37 = vunpack.i.l.bf16 %v5289_v62  ;;  %v5296_v61 = vunpack.i.h.bf16 %v5294_v23 }
 0x5e9   : > { %v5307_v5 = vpack.i.bf16 %v4486_v21, %v4350_v46  ;;  %v5302_v41 = vpack.i.bf16 %v4485_v42, %v4349_v59  ;;  %v5317_v50 = vpack.i.bf16 %v4488_v35, %v4352_v2  ;;  %v5312_v40 = vpack.i.bf16 %v4487_v32, %v4351_v45  ;;  %5180 = vmatpush3.bf16.xpose.msra.mxu0 %v4614_v3  ;;  %v5299_v53 = vpop.permute.xlu1 %5298 }
 0x5ea   : > { %v5295_v14 = vunpack.i.l.bf16 %v5294_v23  ;;  %v4546_v63 = vsel %vm2279_vm2, %v4481_v8, %v5291_v24  ;;  %v4545_v20 = vsel %vm2279_vm2, %v4345_v12, %v5290_v37  ;;  %v5301_v55 = vunpack.i.h.bf16 %v5299_v53 }
 0x5eb   : > { %5308 = vrot.lane.b32.xlu0 %v5307_v5, %s5616_s6  ;;  %5303 = vrot.lane.b32.xlu1 %v5302_v41, %s5617_s28  ;;  %v5300_v58 = vunpack.i.l.bf16 %v5299_v53  ;;  %v4549_v49 = vsel %vm4547_vm4, %v4546_v63, %v5296_v61 }
 0x5ec   : > { %v4548_v25 = vsel %vm4547_vm4, %v4545_v20, %v5295_v14  ;;  %v4552_v38 = vsel %vm4550_vm5, %v4549_v49, %v5301_v55 }
 0x5ed   : > { %v4551_v43 = vsel %vm4550_vm5, %v4548_v25, %v5300_v58 }
 0x5ef   : > { %5318 = vrot.lane.b32.xlu0 %v5317_v50, %s5618_s11  ;;  %5313 = vrot.lane.b32.xlu1 %v5312_v40, %s5619_s26 }
 0x65d   : > { %v5309_v33 = vpop.permute.xlu0 %5308  ;;  %v5304_v7 = vpop.permute.xlu1 %5303 }
 0x65e   : > { %v5306_v15 = vunpack.i.h.bf16 %v5304_v7  ;;  %v5305_v52 = vunpack.i.l.bf16 %v5304_v7  ;;  %v5311_v16 = vunpack.i.h.bf16 %v5309_v33  ;;  %v5310_v47 = vunpack.i.l.bf16 %v5309_v33 }
 0x660   : > { %v4554_v8 = vsel %vm4553_vm6, %v4551_v43, %v5305_v52  ;;  %v4555_v60 = vsel %vm4553_vm6, %v4552_v38, %v5306_v15 }
 0x661   : > { %v5319_v34 = vpop.permute.xlu0 %5318  ;;  %v5314_v6 = vpop.permute.xlu1 %5313  ;;  %v4557_v11 = vsel %vm4556_vm7, %v4554_v8, %v5310_v47  ;;  %v4558_v17 = vsel %vm4556_vm7, %v4555_v60, %v5311_v16 }
 0x662   : > { %v5321_v12 = vunpack.i.h.bf16 %v5319_v34  ;;  %v5320_v1 = vunpack.i.l.bf16 %v5319_v34  ;;  %v5316_v26 = vunpack.i.h.bf16 %v5314_v6  ;;  %v5315_v13 = vunpack.i.l.bf16 %v5314_v6 }
 0x664   : > { %v4560_v36 = vsel %vm4559_vm8, %v4557_v11, %v5315_v13  ;;  %v4561_v39 = vsel %vm4559_vm8, %v4558_v17, %v5316_v26 }
 0x665   : > { %v4563_v44 = vsel %vm4562_vm9, %v4560_v36, %v5320_v1  ;;  %v4564_v31 = vsel %vm4562_vm9, %v4561_v39, %v5321_v12 }
 0x666   : > { %v4565_v19 = vpack.c.bf16 %v4564_v31, %v4563_v44 }
 0x668   : > { %5182 = vmatmul.mubr.msk.bf16.vlgmr.msra.gmra.mrb[36].mxu0 %vm348_vm0, %v4565_v19 }
 0x73b   : > { %v4650_v29 = vpop.f32.mrb[36].mxu0 }
 0x73c   : > { %v4651_v48 = vadd.f32 %v4899_v0, %v4650_v29  ;;  %v5183_v57 = vpop.f32.mrb[37].mxu0 }
 0x73d   : > { %v4653_v28 = vpop.f32.mrb[38].mxu0 }
 0x73e   : > { %4657 = vst.msk [vmem:[%s257_s21] sm:$0xff] %vm348_vm0, %v4651_v48  ;;  %v4654_v9 = vadd.f32 %v4899_v0, %v4653_v28  ;;  %v5184_v30 = vpop.f32.mrb[39].mxu0 }
 0x740   : > { %4658 = vst.msk [vmem:[%s257_s21 + $0x8] sm:$0xff] %vm348_vm0, %v4654_v9 }
 0x741   : > { %5529 = shalt.err (!%p5526_p4)
}
 0x742   : > { %s5530_s29 = scalar_lea.hbm %s6798_s20, 256  ;;  %s5534_s11 = scalar_lea.hbm %s6848_s4, 512 }
 0x743   : > { %p5531_p9 = scmp.ne.s32.totalorder %s6798_s20, %s5530_s29  ;;  %p5535_p8 = scmp.lt.u32.totalorder %s6798_s20, %s6848_s4 }
 0x744   : > { %p5536_p13 = scmp.lt.u32.totalorder %s5534_s11, %s5530_s29  ;;  %p5538_p10 = scmp.lt.u32.totalorder %s5530_s29, %s6798_s20 }
 0x745   : > { %p5532_p0 = pnand %p5531_p9, %p5792_p5 }
 0x746   : > { %p5537_p6 = por %p5536_p13, %p5535_p8 }
 0x747   : > { %p5533_p11 = pneg %p5532_p0 }
 0x748   : > { %p5539_p3 = por %p5538_p10, %p5537_p6 }
 0x74a   : > { %p5540_p7 = pnand %p5539_p3, %p5533_p11 }
 0x74c   : > { %5543 = shalt.err (!%p5540_p7)
}
 0x74d   : > { %s5621_s5 = smov 128  }
 0x74e   : > { %5199 = dma.vmem_to_hbm [thread:$0]  (%p5792_p5), %s6792_s23, 256, %s6798_s20, %s4660_s19, %s5621_s5, %s5621_s5, %s5614_s27  }
 0x74f PF: > { %s4688_s7 = sand.u32 1, %s5578_s15   ;;  %p6866_p12 = scmp.ne.s32.totalorder %s6853_s22, 0 }
 0x750   : > { %p6867_p2 = scmp.ge.s32.totalorder %s5590_s18, 2  ;;  %s4689_s8 = scalar_lea.sflag [#allocation4], %s4688_s7 }
 0x752   : > { %p5216_p1 = pnand %p6867_p2, %p6866_p12 }
 0x754   : > { %5573 = dma.done.wait (!%p5216_p1), %s4689_s8, 256  }
 0x755   : > { %5575 = vsyncadd (!%p5216_p1), %s4689_s8, 4294967040  ;;  %p19_p4 = scmp.ge.s32.totalorder %s5778_s10, 4   ;;  %s6868_s15 = smov %s5582_s16 }
 0x756   : > { %s6869_s16 = smov %s5586_s17  ;;  %s6870_s17 = smov %s5788_s25 }
 0x757   : > { %s6871_s18 = smov %s5778_s10  ;;  %21 = sbr.rel (!%p19_p4) target bundleno = 7 (0x7), region = 93 }
 0x75e   :  { %4694 = vsyncpa [#allocation3], 1 }
 0x75f   :  { %4696 = vsyncpa [#allocation3 + $0x1], 1 }
 0x760   :  { %4697 = vsyncpa [#allocation6], 1 }
 0x761   :  { %4698 = vsyncpa [#allocation9], 1 }
 0x762   :  { %4699 = vsyncpa [#allocation4], 1 }
 0x763   :  { %4701 = vsyncpa [#allocation4 + $0x1], 1 }

</bundles_post_ra>
